<compile_context>
chip_gen: v7x
topology: tpu7x:2x2x1
jax: 0.10.0
libtpu: 0.0.40
codegen_flags: <defaults>
</compile_context>

<pallas_src>
import math
from functools import partial

import jax
import jax.numpy as jnp
from jax.experimental import pallas as pl
from jax.experimental.pallas import tpu as pltpu


_VMEM_LIMIT_BYTES = 48 * 1024 * 1024   # > v5e's 16 MiB scoped default, < v7x's 64 MiB


# ----------------------------------------------------------------------------
# Tiling helper
# ----------------------------------------------------------------------------
def _pick_tile(n, pref, align=128, min_align=16):
    """Largest tile <= pref dividing n, preferring `align`-multiples (MXU-friendly),
    then `min_align`-multiples (sublane-friendly); falls back to the full dim."""
    if n <= pref:
        return n
    for a in (align, min_align):
        t = (pref // a) * a
        while t >= a:
            if n % t == 0:
                return t
            t -= a
    return n


# ----------------------------------------------------------------------------
# Shared helpers
# ----------------------------------------------------------------------------
def _add_layernorm(x, y, gamma, beta):
    """LayerNorm(x + y) over last dim, eps = 1e-5 (PyTorch default), f32 stats."""
    z = x + y
    mu = jnp.mean(z, axis=-1, keepdims=True)
    var = jnp.mean((z - mu) ** 2, axis=-1, keepdims=True)
    return (z - mu) * jax.lax.rsqrt(var + 1e-5) * gamma + beta


# ----------------------------------------------------------------------------
# Fused attention block (Q/KV proj + attention + out proj + residual + LayerNorm)
# Grid: (batch, query-tile); KV source kept fully resident in VMEM per step.
# ----------------------------------------------------------------------------
def _attn_block_kernel(num_heads,
                       x_ref, kv_ref, wq_ref, bq_ref, wkv_ref, bkv_ref,
                       wo_ref, bo_ref, g_ref, b_ref, o_ref):
    D = x_ref.shape[2]
    Dh = D // num_heads

    xq = x_ref[0]                                   # (TQ, D)  bf16 query tile
    src = kv_ref[0]                                 # (Sk, D)  bf16 KV source

    # Q projection (softmax scale already folded into wq/bq at prepare_params time).
    q = jnp.dot(xq, wq_ref[...], preferred_element_type=jnp.float32) + bq_ref[...]
    # fused K,V projection of the KV source.
    kv = jnp.dot(src, wkv_ref[...], preferred_element_type=jnp.float32) + bkv_ref[...]
    k = kv[:, :D]
    v = kv[:, D:]

    wo = wo_ref[...]                                # (D, D) bf16, loaded once

    # Per-head attention; the head concat is folded into the output projection.
    attn = jnp.zeros((xq.shape[0], D), jnp.float32)
    for h in range(num_heads):                      # static loop over heads
        lo, hi = h * Dh, (h + 1) * Dh
        qh = q[:, lo:hi].astype(jnp.bfloat16)
        kh = k[:, lo:hi].astype(jnp.bfloat16)
        vh = v[:, lo:hi].astype(jnp.bfloat16)
        # scores = q @ k^T (contract head_dim, no materialised transpose)
        s = jax.lax.dot_general(qh, kh, (((1,), (1,)), ((), ())),
                                preferred_element_type=jnp.float32)
        m = jnp.max(s, axis=-1, keepdims=True)
        e = jnp.exp(s - m)
        p = e * pl.reciprocal(jnp.sum(e, axis=-1, keepdims=True),
                              approx=True)          # EUP reciprocal, not VALU divide
        ctx = jnp.dot(p.astype(jnp.bfloat16), vh,
                      preferred_element_type=jnp.float32)
        attn = attn + jnp.dot(ctx.astype(jnp.bfloat16), wo[lo:hi, :],
                              preferred_element_type=jnp.float32)
    attn = attn + bo_ref[...]

    # dropout = identity (eval mode); residual + LayerNorm in f32, store bf16.
    o_ref[0] = _add_layernorm(xq.astype(jnp.float32), attn,
                              g_ref[...], b_ref[...]).astype(o_ref.dtype)


def attention_block(x, kv_src, p, num_heads):
    """x: (B, Sq, D) bf16, kv_src: (B, Sk, D) bf16 -> LayerNorm(x + Attn(x, kv_src))."""
    B, Sq, D = x.shape
    Sk = kv_src.shape[1]
    TQ = _pick_tile(Sq, 128)

    resident = lambda shape: pl.BlockSpec(shape, lambda *_: (0, 0),
                                          pipeline_mode=pl.Buffered(1))
    return pl.pallas_call(
        partial(_attn_block_kernel, num_heads),
        out_shape=jax.ShapeDtypeStruct((B, Sq, D), jnp.bfloat16),
        grid=(B, Sq // TQ),
        in_specs=[
            pl.BlockSpec((1, TQ, D), lambda b, qi: (b, qi, 0)),   # query tile
            pl.BlockSpec((1, Sk, D), lambda b, qi: (b, 0, 0)),    # full KV source
            resident((D, D)), resident((1, D)),                   # wq, bq (scaled)
            resident((D, 2 * D)), resident((1, 2 * D)),           # wkv, bkv
            resident((D, D)), resident((1, D)),                   # wo, bo
            resident((1, D)), resident((1, D)),                   # ln gamma, beta
        ],
        out_specs=pl.BlockSpec((1, TQ, D), lambda b, qi: (b, qi, 0)),
        compiler_params=pltpu.CompilerParams(
            dimension_semantics=("parallel", "parallel"),
            vmem_limit_bytes=_VMEM_LIMIT_BYTES),
    )(x, kv_src, p["wq"], p["bq"], p["wkv"], p["bkv"], p["wo"], p["bo"],
      p["ln_g"], p["ln_b"])


# ----------------------------------------------------------------------------
# Fused FFN block (Linear -> ReLU -> Linear -> +residual -> LayerNorm)
# ----------------------------------------------------------------------------
def _ffn_block_kernel(x_ref, w1_ref, b1_ref, w2_ref, b2_ref, g_ref, b_ref, o_ref):
    x = x_ref[...]                                                # (TM, D) bf16
    h = jnp.dot(x, w1_ref[...], preferred_element_type=jnp.float32) + b1_ref[...]
    h = jnp.maximum(h, 0.0)
    ff = jnp.dot(h.astype(jnp.bfloat16), w2_ref[...],
                 preferred_element_type=jnp.float32) + b2_ref[...]
    o_ref[...] = _add_layernorm(x.astype(jnp.float32), ff,
                                g_ref[...], b_ref[...]).astype(o_ref.dtype)


def ffn_block(x2d, p):
    """x2d: (M, D) bf16 tokens -> (M, D) bf16; tiled over M with resident weights."""
    M, D = x2d.shape
    F = p["w1"].shape[1]
    TM = _pick_tile(M, 256)
    resident = lambda shape: pl.BlockSpec(shape, lambda *_: (0, 0),
                                          pipeline_mode=pl.Buffered(1))
    return pl.pallas_call(
        _ffn_block_kernel,
        out_shape=jax.ShapeDtypeStruct((M, D), jnp.bfloat16),
        grid=(M // TM,),
        in_specs=[
            pl.BlockSpec((TM, D), lambda i: (i, 0)),
            resident((D, F)), resident((1, F)),
            resident((F, D)), resident((1, D)),
            resident((1, D)), resident((1, D)),
        ],
        out_specs=pl.BlockSpec((TM, D), lambda i: (i, 0)),
        compiler_params=pltpu.CompilerParams(
            dimension_semantics=("parallel",),
            vmem_limit_bytes=_VMEM_LIMIT_BYTES),
    )(x2d, p["w1"], p["b1"], p["w2"], p["b2"], p["ln_g"], p["ln_b"])


# ----------------------------------------------------------------------------
# Output projection, tiled over tokens (M) and padded vocab (Vp, multiple of 128)
# ----------------------------------------------------------------------------
def _out_proj_kernel(x_ref, w_ref, b_ref, o_ref):
    o_ref[...] = jnp.dot(x_ref[...], w_ref[...],
                         preferred_element_type=jnp.float32) + b_ref[...]


def output_projection(x2d, w, b):
    """x2d: (M, D) bf16 @ w: (D, Vp) bf16 + b: (1, Vp) -> (M, Vp) f32 logits."""
    M, D = x2d.shape
    Vp = w.shape[1]
    TM = _pick_tile(M, 512)
    TV = _pick_tile(Vp, 1024, align=128, min_align=128)   # Vp % 128 == 0 by construction
    return pl.pallas_call(
        _out_proj_kernel,
        out_shape=jax.ShapeDtypeStruct((M, Vp), jnp.float32),
        grid=(M // TM, Vp // TV),
        in_specs=[
            pl.BlockSpec((TM, D), lambda i, j: (i, 0)),
            pl.BlockSpec((D, TV), lambda i, j: (0, j)),
            pl.BlockSpec((1, TV), lambda i, j: (0, j)),
        ],
        out_specs=pl.BlockSpec((TM, TV), lambda i, j: (i, j)),
        compiler_params=pltpu.CompilerParams(
            dimension_semantics=("parallel", "parallel"),
            vmem_limit_bytes=_VMEM_LIMIT_BYTES),
    )(x2d, w, b)


# ----------------------------------------------------------------------------
# Model glue (plain JAX: embedding gather, pos-enc add, layer loop)
# ----------------------------------------------------------------------------
def sinusoidal_pos_encoding(max_len, d_model):
    pos = jnp.arange(max_len, dtype=jnp.float32)[:, None]
    div = jnp.exp(jnp.arange(0, d_model, 2, dtype=jnp.float32)
                  * (-math.log(10000.0) / d_model))
    pe = jnp.zeros((max_len, d_model), dtype=jnp.float32)
    pe = pe.at[:, 0::2].set(jnp.sin(pos * div))
    pe = pe.at[:, 1::2].set(jnp.cos(pos * div))
    return pe


def transformer_decoder(params, tgt_tokens, encoder_output, num_heads, vocab_size):
    """tgt_tokens: (B, S) int32; encoder_output: (B, S_src, D) -> logits (B, S, V)."""
    B, S = tgt_tokens.shape
    D = params["embedding"].shape[1]

    x = params["embedding"][tgt_tokens]                   # embedding gather (glue)
    x = x + params["pos_enc"][:S][None, :, :]             # positional encoding (f32)
    x = x.astype(jnp.bfloat16)                            # bf16 residual stream in HBM
    enc = encoder_output.astype(jnp.bfloat16)
    # (PyTorch transposes to (S, B, D) here; token-major layout makes it a no-op.)
    for lp in params["layers"]:
        x = attention_block(x, x, lp["self_attn"], num_heads)     # self-attn + LN
        x = attention_block(x, enc, lp["cross_attn"], num_heads)  # cross-attn + LN
        x = ffn_block(x.reshape(B * S, D), lp["ffn"]).reshape(B, S, D)
    logits = output_projection(x.reshape(B * S, D), params["out_w"], params["out_b"])
    return logits[:, :vocab_size].reshape(B, S, vocab_size)


# ----------------------------------------------------------------------------
# Parameter init (PyTorch-like, weights stored as (in, out) = W_pt.T) and a
# one-time layout prep: fuse KV weights, fold softmax scale into Q, cast MXU
# weights to bf16, pad vocab to a multiple of 128, hoist (1, D) bias reshapes.
# ----------------------------------------------------------------------------
def init_params(key, vocab_size, d_model, ff_dim, num_layers, max_len=64):
    def dense(k, din, dout, scale=0.05):
        kw, kb = jax.random.split(k)
        return (scale * jax.random.normal(kw, (din, dout), jnp.float32),
                scale * jax.random.normal(kb, (dout,), jnp.float32))

    keys = jax.random.split(key, 2 + num_layers)
    params = {
        "embedding": 0.05 * jax.random.normal(keys[0], (vocab_size, d_model), jnp.float32),
        "pos_enc": sinusoidal_pos_encoding(max_len, d_model),
        "layers": [],
    }
    params["out_w"], params["out_b"] = dense(keys[1], d_model, vocab_size)

    for li in range(num_layers):
        lk = jax.random.split(keys[2 + li], 12)

        def attn_params(ks):
            p = {}
            p["wq"], p["bq"] = dense(ks[0], d_model, d_model)
            p["wk"], p["bk"] = dense(ks[1], d_model, d_model)
            p["wv"], p["bv"] = dense(ks[2], d_model, d_model)
            p["wo"], p["bo"] = dense(ks[3], d_model, d_model)
            return p

        lp = {
            "self_attn": attn_params(lk[0:4]),
            "cross_attn": attn_params(lk[4:8]),
        }
        lp["ff_w1"], lp["ff_b1"] = dense(lk[8], d_model, ff_dim)
        lp["ff_w2"], lp["ff_b2"] = dense(lk[9], ff_dim, d_model)
        for name in ("ln1", "ln2", "ln3"):       # PyTorch LayerNorm default init
            lp[f"{name}_g"] = jnp.ones((d_model,), jnp.float32)
            lp[f"{name}_b"] = jnp.zeros((d_model,), jnp.float32)
        params["layers"].append(lp)
    return params


def prepare_params(params, num_heads):
    D = params["embedding"].shape[1]
    scale = 1.0 / math.sqrt(D // num_heads)     # folded into the Q projection
    row = lambda b: b.reshape(1, -1).astype(jnp.float32)
    bf16 = lambda w: w.astype(jnp.bfloat16)

    V = params["out_w"].shape[1]
    Vp = ((V + 127) // 128) * 128               # lane-dense padded vocab
    out_w = jnp.pad(params["out_w"], ((0, 0), (0, Vp - V)))
    out_b = jnp.pad(params["out_b"], (0, Vp - V))

    def attn(p, ln_g, ln_b):
        return {
            "wq": bf16(p["wq"] * scale),        # softmax scale folded in (weights+bias)
            "bq": row(p["bq"] * scale),
            "wkv": bf16(jnp.concatenate([p["wk"], p["wv"]], axis=1)),
            "bkv": row(jnp.concatenate([p["bk"], p["bv"]])),
            "wo": bf16(p["wo"]), "bo": row(p["bo"]),
            "ln_g": row(ln_g), "ln_b": row(ln_b),
        }

    out = {
        "embedding": params["embedding"],
        "pos_enc": params["pos_enc"],
        "out_w": bf16(out_w),
        "out_b": row(out_b),
        "layers": [],
    }
    for lp in params["layers"]:
        out["layers"].append({
            "self_attn": attn(lp["self_attn"], lp["ln1_g"], lp["ln1_b"]),
            "cross_attn": attn(lp["cross_attn"], lp["ln2_g"], lp["ln2_b"]),
            "ffn": {
                "w1": bf16(lp["ff_w1"]), "b1": row(lp["ff_b1"]),
                "w2": bf16(lp["ff_w2"]), "b2": row(lp["ff_b2"]),
                "ln_g": row(lp["ln3_g"]), "ln_b": row(lp["ln3_b"]),
            },
        })
    return out


# ----------------------------------------------------------------------------
if __name__ == "__main__":
    vocab_size = 50
    d_model = 32
    num_heads = 4
    ff_dim = 64
    num_layers = 2
    B, S_tgt, S_src = 2, 8, 10

    root = jax.random.PRNGKey(0)
    k_params, k_tgt, k_enc = jax.random.split(root, 3)

    params = prepare_params(
        init_params(k_params, vocab_size, d_model, ff_dim, num_layers), num_heads)
    tgt = jax.random.randint(k_tgt, (B, S_tgt), 0, vocab_size, dtype=jnp.int32)
    encoder_output = jax.random.normal(k_enc, (B, S_src, d_model), jnp.float32)

    fwd = jax.jit(partial(transformer_decoder,
                          num_heads=num_heads, vocab_size=vocab_size))
    logits = jax.block_until_ready(fwd(params, tgt, encoder_output))

    assert logits.shape == (B, S_tgt, vocab_size)
    assert bool(jnp.all(jnp.isfinite(logits)))
    print("KERNEL_OK")
</pallas_src>

<mosaic_0001>
module attributes {stable_mosaic.version = 11 : i64} {
  func.func @_attn_block_kernel(%arg0: i32, %arg1: i32, %arg2: memref<1x8x32xbf16, #tpu.memory_space<vmem>>, %arg3: memref<1x8x32xbf16, #tpu.memory_space<vmem>>, %arg4: memref<32x32xbf16, #tpu.memory_space<vmem>>, %arg5: memref<1x32xf32, #tpu.memory_space<vmem>>, %arg6: memref<32x64xbf16, #tpu.memory_space<vmem>>, %arg7: memref<1x64xf32, #tpu.memory_space<vmem>>, %arg8: memref<32x32xbf16, #tpu.memory_space<vmem>>, %arg9: memref<1x32xf32, #tpu.memory_space<vmem>>, %arg10: memref<1x32xf32, #tpu.memory_space<vmem>>, %arg11: memref<1x32xf32, #tpu.memory_space<vmem>>, %arg12: memref<1x8x32xbf16, #tpu.memory_space<vmem>>) attributes {dimension_semantics = [#tpu.dimension_semantics<parallel>, #tpu.dimension_semantics<parallel>], iteration_bounds = array<i64: 2, 1>, scalar_prefetch = 0 : i64, scratch_operands = 0 : i64, tpu.core_type = #tpu.core_type<tc>, window_params = [{transform_indices = @transform_0, window_bounds = array<i64: 1, 8, 32>}, {transform_indices = @transform_1, window_bounds = array<i64: 1, 8, 32>}, {pipeline_mode = #tpu.pipeline_mode<synchronous>, transform_indices = @transform_2, window_bounds = array<i64: 32, 32>}, {pipeline_mode = #tpu.pipeline_mode<synchronous>, transform_indices = @transform_3, window_bounds = array<i64: 1, 32>}, {pipeline_mode = #tpu.pipeline_mode<synchronous>, transform_indices = @transform_4, window_bounds = array<i64: 32, 64>}, {pipeline_mode = #tpu.pipeline_mode<synchronous>, transform_indices = @transform_5, window_bounds = array<i64: 1, 64>}, {pipeline_mode = #tpu.pipeline_mode<synchronous>, transform_indices = @transform_6, window_bounds = array<i64: 32, 32>}, {pipeline_mode = #tpu.pipeline_mode<synchronous>, transform_indices = @transform_7, window_bounds = array<i64: 1, 32>}, {pipeline_mode = #tpu.pipeline_mode<synchronous>, transform_indices = @transform_8, window_bounds = array<i64: 1, 32>}, {pipeline_mode = #tpu.pipeline_mode<synchronous>, transform_indices = @transform_9, window_bounds = array<i64: 1, 32>}, {transform_indices = @transform_10, window_bounds = array<i64: 1, 8, 32>}]} {
    %c0 = arith.constant 0 : index
    %c0_0 = arith.constant 0 : index
    %c0_1 = arith.constant 0 : index
    %0 = vector.load %arg2[%c0, %c0_0, %c0_1] : memref<1x8x32xbf16, #tpu.memory_space<vmem>>, vector<1x8x32xbf16>
    %1 = vector.shape_cast %0 : vector<1x8x32xbf16> to vector<8x32xbf16>
    %c0_2 = arith.constant 0 : index
    %c0_3 = arith.constant 0 : index
    %c0_4 = arith.constant 0 : index
    %2 = vector.load %arg3[%c0_2, %c0_3, %c0_4] : memref<1x8x32xbf16, #tpu.memory_space<vmem>>, vector<1x8x32xbf16>
    %3 = vector.shape_cast %2 : vector<1x8x32xbf16> to vector<8x32xbf16>
    %c0_5 = arith.constant 0 : index
    %c0_6 = arith.constant 0 : index
    %4 = vector.load %arg4[%c0_5, %c0_6] : memref<32x32xbf16, #tpu.memory_space<vmem>>, vector<32x32xbf16>
    %cst = arith.constant dense<0.000000e+00> : vector<8x32xf32>
    %5 = tpu.matmul %1, %4, %cst {dimension_numbers = #tpu.dot_dimension_numbers<[1], [0], [0], [1], [0, 0, 1, 1], [], []>} : vector<8x32xbf16>, vector<32x32xbf16>, vector<8x32xf32> -> vector<8x32xf32>
    %c0_7 = arith.constant 0 : index
    %c0_8 = arith.constant 0 : index
    %6 = vector.load %arg5[%c0_7, %c0_8] : memref<1x32xf32, #tpu.memory_space<vmem>>, vector<1x32xf32>
    %7 = vector.broadcast %6 : vector<1x32xf32> to vector<8x32xf32>
    %8 = arith.addf %5, %7 : vector<8x32xf32>
    %c0_9 = arith.constant 0 : index
    %c0_10 = arith.constant 0 : index
    %9 = vector.load %arg6[%c0_9, %c0_10] : memref<32x64xbf16, #tpu.memory_space<vmem>>, vector<32x64xbf16>
    %cst_11 = arith.constant dense<0.000000e+00> : vector<8x64xf32>
    %10 = tpu.matmul %3, %9, %cst_11 {dimension_numbers = #tpu.dot_dimension_numbers<[1], [0], [0], [1], [0, 0, 1, 1], [], []>} : vector<8x32xbf16>, vector<32x64xbf16>, vector<8x64xf32> -> vector<8x64xf32>
    %c0_12 = arith.constant 0 : index
    %c0_13 = arith.constant 0 : index
    %11 = vector.load %arg7[%c0_12, %c0_13] : memref<1x64xf32, #tpu.memory_space<vmem>>, vector<1x64xf32>
    %12 = vector.broadcast %11 : vector<1x64xf32> to vector<8x64xf32>
    %13 = arith.addf %10, %12 : vector<8x64xf32>
    %14 = vector.extract_strided_slice %13 {offsets = [0, 0], sizes = [8, 32], strides = [1, 1]} : vector<8x64xf32> to vector<8x32xf32>
    %15 = vector.extract_strided_slice %13 {offsets = [0, 32], sizes = [8, 32], strides = [1, 1]} : vector<8x64xf32> to vector<8x32xf32>
    %c0_14 = arith.constant 0 : index
    %c0_15 = arith.constant 0 : index
    %16 = vector.load %arg8[%c0_14, %c0_15] : memref<32x32xbf16, #tpu.memory_space<vmem>>, vector<32x32xbf16>
    %cst_16 = arith.constant 0.000000e+00 : f32
    %17 = vector.broadcast %cst_16 : f32 to vector<8x32xf32>
    %18 = vector.extract_strided_slice %8 {offsets = [0, 0], sizes = [8, 8], strides = [1, 1]} : vector<8x32xf32> to vector<8x8xf32>
    %19 = arith.truncf %18 : vector<8x8xf32> to vector<8x8xbf16>
    %20 = vector.extract_strided_slice %14 {offsets = [0, 0], sizes = [8, 8], strides = [1, 1]} : vector<8x32xf32> to vector<8x8xf32>
    %21 = arith.truncf %20 : vector<8x8xf32> to vector<8x8xbf16>
    %22 = vector.extract_strided_slice %15 {offsets = [0, 0], sizes = [8, 8], strides = [1, 1]} : vector<8x32xf32> to vector<8x8xf32>
    %23 = arith.truncf %22 : vector<8x8xf32> to vector<8x8xbf16>
    %cst_17 = arith.constant dense<0.000000e+00> : vector<8x8xf32>
    %24 = tpu.matmul %19, %21, %cst_17 {dimension_numbers = #tpu.dot_dimension_numbers<[1], [1], [0], [0], [0, 0, 1, 0], [], []>} : vector<8x8xbf16>, vector<8x8xbf16>, vector<8x8xf32> -> vector<8x8xf32>
    %cst_18 = arith.constant dense<0xFF800000> : vector<8xf32>
    %25 = vector.multi_reduction <maximumf>, %24, %cst_18 [1] : vector<8x8xf32> to vector<8xf32>
    %26 = vector.shape_cast %25 : vector<8xf32> to vector<8x1xf32>
    %27 = vector.broadcast %26 : vector<8x1xf32> to vector<8x8xf32>
    %28 = arith.subf %24, %27 : vector<8x8xf32>
    %29 = math.exp %28 : vector<8x8xf32>
    %cst_19 = arith.constant dense<0.000000e+00> : vector<8xf32>
    %30 = vector.multi_reduction <add>, %29, %cst_19 [1] : vector<8x8xf32> to vector<8xf32>
    %31 = vector.shape_cast %30 : vector<8xf32> to vector<8x1xf32>
    %32 = tpu.reciprocal %31 {approx = true} : vector<8x1xf32> -> vector<8x1xf32>
    %33 = vector.broadcast %32 : vector<8x1xf32> to vector<8x8xf32>
    %34 = arith.mulf %29, %33 : vector<8x8xf32>
    %35 = arith.truncf %34 : vector<8x8xf32> to vector<8x8xbf16>
    %cst_20 = arith.constant dense<0.000000e+00> : vector<8x8xf32>
    %36 = tpu.matmul %35, %23, %cst_20 {dimension_numbers = #tpu.dot_dimension_numbers<[1], [0], [0], [1], [0, 0, 1, 1], [], []>} : vector<8x8xbf16>, vector<8x8xbf16>, vector<8x8xf32> -> vector<8x8xf32>
    %37 = arith.truncf %36 : vector<8x8xf32> to vector<8x8xbf16>
    %38 = vector.extract_strided_slice %16 {offsets = [0, 0], sizes = [8, 32], strides = [1, 1]} : vector<32x32xbf16> to vector<8x32xbf16>
    %cst_21 = arith.constant dense<0.000000e+00> : vector<8x32xf32>
    %39 = tpu.matmul %37, %38, %cst_21 {dimension_numbers = #tpu.dot_dimension_numbers<[1], [0], [0], [1], [0, 0, 1, 1], [], []>} : vector<8x8xbf16>, vector<8x32xbf16>, vector<8x32xf32> -> vector<8x32xf32>
    %40 = arith.addf %17, %39 : vector<8x32xf32>
    %41 = vector.extract_strided_slice %8 {offsets = [0, 8], sizes = [8, 8], strides = [1, 1]} : vector<8x32xf32> to vector<8x8xf32>
    %42 = arith.truncf %41 : vector<8x8xf32> to vector<8x8xbf16>
    %43 = vector.extract_strided_slice %14 {offsets = [0, 8], sizes = [8, 8], strides = [1, 1]} : vector<8x32xf32> to vector<8x8xf32>
    %44 = arith.truncf %43 : vector<8x8xf32> to vector<8x8xbf16>
    %45 = vector.extract_strided_slice %15 {offsets = [0, 8], sizes = [8, 8], strides = [1, 1]} : vector<8x32xf32> to vector<8x8xf32>
    %46 = arith.truncf %45 : vector<8x8xf32> to vector<8x8xbf16>
    %cst_22 = arith.constant dense<0.000000e+00> : vector<8x8xf32>
    %47 = tpu.matmul %42, %44, %cst_22 {dimension_numbers = #tpu.dot_dimension_numbers<[1], [1], [0], [0], [0, 0, 1, 0], [], []>} : vector<8x8xbf16>, vector<8x8xbf16>, vector<8x8xf32> -> vector<8x8xf32>
    %cst_23 = arith.constant dense<0xFF800000> : vector<8xf32>
    %48 = vector.multi_reduction <maximumf>, %47, %cst_23 [1] : vector<8x8xf32> to vector<8xf32>
    %49 = vector.shape_cast %48 : vector<8xf32> to vector<8x1xf32>
    %50 = vector.broadcast %49 : vector<8x1xf32> to vector<8x8xf32>
    %51 = arith.subf %47, %50 : vector<8x8xf32>
    %52 = math.exp %51 : vector<8x8xf32>
    %cst_24 = arith.constant dense<0.000000e+00> : vector<8xf32>
    %53 = vector.multi_reduction <add>, %52, %cst_24 [1] : vector<8x8xf32> to vector<8xf32>
    %54 = vector.shape_cast %53 : vector<8xf32> to vector<8x1xf32>
    %55 = tpu.reciprocal %54 {approx = true} : vector<8x1xf32> -> vector<8x1xf32>
    %56 = vector.broadcast %55 : vector<8x1xf32> to vector<8x8xf32>
    %57 = arith.mulf %52, %56 : vector<8x8xf32>
    %58 = arith.truncf %57 : vector<8x8xf32> to vector<8x8xbf16>
    %cst_25 = arith.constant dense<0.000000e+00> : vector<8x8xf32>
    %59 = tpu.matmul %58, %46, %cst_25 {dimension_numbers = #tpu.dot_dimension_numbers<[1], [0], [0], [1], [0, 0, 1, 1], [], []>} : vector<8x8xbf16>, vector<8x8xbf16>, vector<8x8xf32> -> vector<8x8xf32>
    %60 = arith.truncf %59 : vector<8x8xf32> to vector<8x8xbf16>
    %61 = vector.extract_strided_slice %16 {offsets = [8, 0], sizes = [8, 32], strides = [1, 1]} : vector<32x32xbf16> to vector<8x32xbf16>
    %cst_26 = arith.constant dense<0.000000e+00> : vector<8x32xf32>
    %62 = tpu.matmul %60, %61, %cst_26 {dimension_numbers = #tpu.dot_dimension_numbers<[1], [0], [0], [1], [0, 0, 1, 1], [], []>} : vector<8x8xbf16>, vector<8x32xbf16>, vector<8x32xf32> -> vector<8x32xf32>
    %63 = arith.addf %40, %62 : vector<8x32xf32>
    %64 = vector.extract_strided_slice %8 {offsets = [0, 16], sizes = [8, 8], strides = [1, 1]} : vector<8x32xf32> to vector<8x8xf32>
    %65 = arith.truncf %64 : vector<8x8xf32> to vector<8x8xbf16>
    %66 = vector.extract_strided_slice %14 {offsets = [0, 16], sizes = [8, 8], strides = [1, 1]} : vector<8x32xf32> to vector<8x8xf32>
    %67 = arith.truncf %66 : vector<8x8xf32> to vector<8x8xbf16>
    %68 = vector.extract_strided_slice %15 {offsets = [0, 16], sizes = [8, 8], strides = [1, 1]} : vector<8x32xf32> to vector<8x8xf32>
    %69 = arith.truncf %68 : vector<8x8xf32> to vector<8x8xbf16>
    %cst_27 = arith.constant dense<0.000000e+00> : vector<8x8xf32>
    %70 = tpu.matmul %65, %67, %cst_27 {dimension_numbers = #tpu.dot_dimension_numbers<[1], [1], [0], [0], [0, 0, 1, 0], [], []>} : vector<8x8xbf16>, vector<8x8xbf16>, vector<8x8xf32> -> vector<8x8xf32>
    %cst_28 = arith.constant dense<0xFF800000> : vector<8xf32>
    %71 = vector.multi_reduction <maximumf>, %70, %cst_28 [1] : vector<8x8xf32> to vector<8xf32>
    %72 = vector.shape_cast %71 : vector<8xf32> to vector<8x1xf32>
    %73 = vector.broadcast %72 : vector<8x1xf32> to vector<8x8xf32>
    %74 = arith.subf %70, %73 : vector<8x8xf32>
    %75 = math.exp %74 : vector<8x8xf32>
    %cst_29 = arith.constant dense<0.000000e+00> : vector<8xf32>
    %76 = vector.multi_reduction <add>, %75, %cst_29 [1] : vector<8x8xf32> to vector<8xf32>
    %77 = vector.shape_cast %76 : vector<8xf32> to vector<8x1xf32>
    %78 = tpu.reciprocal %77 {approx = true} : vector<8x1xf32> -> vector<8x1xf32>
    %79 = vector.broadcast %78 : vector<8x1xf32> to vector<8x8xf32>
    %80 = arith.mulf %75, %79 : vector<8x8xf32>
    %81 = arith.truncf %80 : vector<8x8xf32> to vector<8x8xbf16>
    %cst_30 = arith.constant dense<0.000000e+00> : vector<8x8xf32>
    %82 = tpu.matmul %81, %69, %cst_30 {dimension_numbers = #tpu.dot_dimension_numbers<[1], [0], [0], [1], [0, 0, 1, 1], [], []>} : vector<8x8xbf16>, vector<8x8xbf16>, vector<8x8xf32> -> vector<8x8xf32>
    %83 = arith.truncf %82 : vector<8x8xf32> to vector<8x8xbf16>
    %84 = vector.extract_strided_slice %16 {offsets = [16, 0], sizes = [8, 32], strides = [1, 1]} : vector<32x32xbf16> to vector<8x32xbf16>
    %cst_31 = arith.constant dense<0.000000e+00> : vector<8x32xf32>
    %85 = tpu.matmul %83, %84, %cst_31 {dimension_numbers = #tpu.dot_dimension_numbers<[1], [0], [0], [1], [0, 0, 1, 1], [], []>} : vector<8x8xbf16>, vector<8x32xbf16>, vector<8x32xf32> -> vector<8x32xf32>
    %86 = arith.addf %63, %85 : vector<8x32xf32>
    %87 = vector.extract_strided_slice %8 {offsets = [0, 24], sizes = [8, 8], strides = [1, 1]} : vector<8x32xf32> to vector<8x8xf32>
    %88 = arith.truncf %87 : vector<8x8xf32> to vector<8x8xbf16>
    %89 = vector.extract_strided_slice %14 {offsets = [0, 24], sizes = [8, 8], strides = [1, 1]} : vector<8x32xf32> to vector<8x8xf32>
    %90 = arith.truncf %89 : vector<8x8xf32> to vector<8x8xbf16>
    %91 = vector.extract_strided_slice %15 {offsets = [0, 24], sizes = [8, 8], strides = [1, 1]} : vector<8x32xf32> to vector<8x8xf32>
    %92 = arith.truncf %91 : vector<8x8xf32> to vector<8x8xbf16>
    %cst_32 = arith.constant dense<0.000000e+00> : vector<8x8xf32>
    %93 = tpu.matmul %88, %90, %cst_32 {dimension_numbers = #tpu.dot_dimension_numbers<[1], [1], [0], [0], [0, 0, 1, 0], [], []>} : vector<8x8xbf16>, vector<8x8xbf16>, vector<8x8xf32> -> vector<8x8xf32>
    %cst_33 = arith.constant dense<0xFF800000> : vector<8xf32>
    %94 = vector.multi_reduction <maximumf>, %93, %cst_33 [1] : vector<8x8xf32> to vector<8xf32>
    %95 = vector.shape_cast %94 : vector<8xf32> to vector<8x1xf32>
    %96 = vector.broadcast %95 : vector<8x1xf32> to vector<8x8xf32>
    %97 = arith.subf %93, %96 : vector<8x8xf32>
    %98 = math.exp %97 : vector<8x8xf32>
    %cst_34 = arith.constant dense<0.000000e+00> : vector<8xf32>
    %99 = vector.multi_reduction <add>, %98, %cst_34 [1] : vector<8x8xf32> to vector<8xf32>
    %100 = vector.shape_cast %99 : vector<8xf32> to vector<8x1xf32>
    %101 = tpu.reciprocal %100 {approx = true} : vector<8x1xf32> -> vector<8x1xf32>
    %102 = vector.broadcast %101 : vector<8x1xf32> to vector<8x8xf32>
    %103 = arith.mulf %98, %102 : vector<8x8xf32>
    %104 = arith.truncf %103 : vector<8x8xf32> to vector<8x8xbf16>
    %cst_35 = arith.constant dense<0.000000e+00> : vector<8x8xf32>
    %105 = tpu.matmul %104, %92, %cst_35 {dimension_numbers = #tpu.dot_dimension_numbers<[1], [0], [0], [1], [0, 0, 1, 1], [], []>} : vector<8x8xbf16>, vector<8x8xbf16>, vector<8x8xf32> -> vector<8x8xf32>
    %106 = arith.truncf %105 : vector<8x8xf32> to vector<8x8xbf16>
    %107 = vector.extract_strided_slice %16 {offsets = [24, 0], sizes = [8, 32], strides = [1, 1]} : vector<32x32xbf16> to vector<8x32xbf16>
    %cst_36 = arith.constant dense<0.000000e+00> : vector<8x32xf32>
    %108 = tpu.matmul %106, %107, %cst_36 {dimension_numbers = #tpu.dot_dimension_numbers<[1], [0], [0], [1], [0, 0, 1, 1], [], []>} : vector<8x8xbf16>, vector<8x32xbf16>, vector<8x32xf32> -> vector<8x32xf32>
    %109 = arith.addf %86, %108 : vector<8x32xf32>
    %c0_37 = arith.constant 0 : index
    %c0_38 = arith.constant 0 : index
    %110 = vector.load %arg9[%c0_37, %c0_38] : memref<1x32xf32, #tpu.memory_space<vmem>>, vector<1x32xf32>
    %111 = vector.broadcast %110 : vector<1x32xf32> to vector<8x32xf32>
    %112 = arith.addf %109, %111 : vector<8x32xf32>
    %113 = arith.extf %1 : vector<8x32xbf16> to vector<8x32xf32>
    %c0_39 = arith.constant 0 : index
    %c0_40 = arith.constant 0 : index
    %114 = vector.load %arg10[%c0_39, %c0_40] : memref<1x32xf32, #tpu.memory_space<vmem>>, vector<1x32xf32>
    %c0_41 = arith.constant 0 : index
    %c0_42 = arith.constant 0 : index
    %115 = vector.load %arg11[%c0_41, %c0_42] : memref<1x32xf32, #tpu.memory_space<vmem>>, vector<1x32xf32>
    %116 = arith.addf %113, %112 : vector<8x32xf32>
    %cst_43 = arith.constant dense<0.000000e+00> : vector<8xf32>
    %117 = vector.multi_reduction <add>, %116, %cst_43 [1] : vector<8x32xf32> to vector<8xf32>
    %118 = vector.shape_cast %117 : vector<8xf32> to vector<8x1xf32>
    %cst_44 = arith.constant 3.200000e+01 : f32
    %119 = vector.broadcast %cst_44 : f32 to vector<8x1xf32>
    %120 = arith.divf %118, %119 : vector<8x1xf32>
    %121 = vector.broadcast %120 : vector<8x1xf32> to vector<8x32xf32>
    %122 = arith.subf %116, %121 : vector<8x32xf32>
    %123 = arith.mulf %122, %122 : vector<8x32xf32>
    %cst_45 = arith.constant dense<0.000000e+00> : vector<8xf32>
    %124 = vector.multi_reduction <add>, %123, %cst_45 [1] : vector<8x32xf32> to vector<8xf32>
    %125 = vector.shape_cast %124 : vector<8xf32> to vector<8x1xf32>
    %cst_46 = arith.constant 3.200000e+01 : f32
    %126 = vector.broadcast %cst_46 : f32 to vector<8x1xf32>
    %127 = arith.divf %125, %126 : vector<8x1xf32>
    %128 = vector.broadcast %120 : vector<8x1xf32> to vector<8x32xf32>
    %129 = arith.subf %116, %128 : vector<8x32xf32>
    %cst_47 = arith.constant 9.99999974E-6 : f32
    %130 = vector.broadcast %cst_47 : f32 to vector<8x1xf32>
    %131 = arith.addf %127, %130 : vector<8x1xf32>
    %132 = math.rsqrt %131 : vector<8x1xf32>
    %133 = vector.broadcast %132 : vector<8x1xf32> to vector<8x32xf32>
    %134 = arith.mulf %129, %133 : vector<8x32xf32>
    %135 = vector.broadcast %114 : vector<1x32xf32> to vector<8x32xf32>
    %136 = arith.mulf %134, %135 : vector<8x32xf32>
    %137 = vector.broadcast %115 : vector<1x32xf32> to vector<8x32xf32>
    %138 = arith.addf %136, %137 : vector<8x32xf32>
    %139 = arith.truncf %138 : vector<8x32xf32> to vector<8x32xbf16>
    %c0_48 = arith.constant 0 : index
    %c0_49 = arith.constant 0 : index
    %c0_50 = arith.constant 0 : index
    %140 = vector.load %arg12[%c0_48, %c0_49, %c0_50] : memref<1x8x32xbf16, #tpu.memory_space<vmem>>, vector<1x8x32xbf16>
    %141 = vector.shape_cast %140 : vector<1x8x32xbf16> to vector<8x32xbf16>
    %142 = vector.shape_cast %139 : vector<8x32xbf16> to vector<1x8x32xbf16>
    tpu.vector_store %arg12[%c0_48, %c0_49, %c0_50], %142 {strides = array<i32>} : memref<1x8x32xbf16, #tpu.memory_space<vmem>>, vector<1x8x32xbf16>,
    return
  }
  func.func @transform_0(%arg0: i32, %arg1: i32) -> (i32, i32, i32) {
    %c0_i32 = arith.constant 0 : i32
    %c0_i32_0 = arith.constant 0 : i32
    return %arg0, %arg1, %c0_i32 : i32, i32, i32
  }
  func.func @transform_1(%arg0: i32, %arg1: i32) -> (i32, i32, i32) {
    %c0_i32 = arith.constant 0 : i32
    %c0_i32_0 = arith.constant 0 : i32
    %c0_i32_1 = arith.constant 0 : i32
    return %arg0, %c0_i32, %c0_i32_0 : i32, i32, i32
  }
  func.func @transform_2(%arg0: i32, %arg1: i32) -> (i32, i32) {
    %c0_i32 = arith.constant 0 : i32
    %c0_i32_0 = arith.constant 0 : i32
    %c0_i32_1 = arith.constant 0 : i32
    return %c0_i32, %c0_i32_0 : i32, i32
  }
  func.func @transform_3(%arg0: i32, %arg1: i32) -> (i32, i32) {
    %c0_i32 = arith.constant 0 : i32
    %c0_i32_0 = arith.constant 0 : i32
    %c0_i32_1 = arith.constant 0 : i32
    return %c0_i32, %c0_i32_0 : i32, i32
  }
  func.func @transform_4(%arg0: i32, %arg1: i32) -> (i32, i32) {
    %c0_i32 = arith.constant 0 : i32
    %c0_i32_0 = arith.constant 0 : i32
    %c0_i32_1 = arith.constant 0 : i32
    return %c0_i32, %c0_i32_0 : i32, i32
  }
  func.func @transform_5(%arg0: i32, %arg1: i32) -> (i32, i32) {
    %c0_i32 = arith.constant 0 : i32
    %c0_i32_0 = arith.constant 0 : i32
    %c0_i32_1 = arith.constant 0 : i32
    return %c0_i32, %c0_i32_0 : i32, i32
  }
  func.func @transform_6(%arg0: i32, %arg1: i32) -> (i32, i32) {
    %c0_i32 = arith.constant 0 : i32
    %c0_i32_0 = arith.constant 0 : i32
    %c0_i32_1 = arith.constant 0 : i32
    return %c0_i32, %c0_i32_0 : i32, i32
  }
  func.func @transform_7(%arg0: i32, %arg1: i32) -> (i32, i32) {
    %c0_i32 = arith.constant 0 : i32
    %c0_i32_0 = arith.constant 0 : i32
    %c0_i32_1 = arith.constant 0 : i32
    return %c0_i32, %c0_i32_0 : i32, i32
  }
  func.func @transform_8(%arg0: i32, %arg1: i32) -> (i32, i32) {
    %c0_i32 = arith.constant 0 : i32
    %c0_i32_0 = arith.constant 0 : i32
    %c0_i32_1 = arith.constant 0 : i32
    return %c0_i32, %c0_i32_0 : i32, i32
  }
  func.func @transform_9(%arg0: i32, %arg1: i32) -> (i32, i32) {
    %c0_i32 = arith.constant 0 : i32
    %c0_i32_0 = arith.constant 0 : i32
    %c0_i32_1 = arith.constant 0 : i32
    return %c0_i32, %c0_i32_0 : i32, i32
  }
  func.func @transform_10(%arg0: i32, %arg1: i32) -> (i32, i32, i32) {
    %c0_i32 = arith.constant 0 : i32
    %c0_i32_0 = arith.constant 0 : i32
    return %arg0, %arg1, %c0_i32 : i32, i32, i32
  }
}

module attributes {stable_mosaic.version = 11 : i64} {
  func.func @_out_proj_kernel(%arg0: i32, %arg1: i32, %arg2: memref<16x32xbf16, #tpu.memory_space<vmem>>, %arg3: memref<32x128xbf16, #tpu.memory_space<vmem>>, %arg4: memref<1x128xf32, #tpu.memory_space<vmem>>, %arg5: memref<16x128xf32, #tpu.memory_space<vmem>>) attributes {dimension_semantics = [#tpu.dimension_semantics<parallel>, #tpu.dimension_semantics<parallel>], iteration_bounds = array<i64: 1, 1>, scalar_prefetch = 0 : i64, scratch_operands = 0 : i64, tpu.core_type = #tpu.core_type<tc>, window_params = [{transform_indices = @transform_0, window_bounds = array<i64: 16, 32>}, {transform_indices = @transform_1, window_bounds = array<i64: 32, 128>}, {transform_indices = @transform_2, window_bounds = array<i64: 1, 128>}, {transform_indices = @transform_3, window_bounds = array<i64: 16, 128>}]} {
    %c0 = arith.constant 0 : index
    %c0_0 = arith.constant 0 : index
    %0 = vector.load %arg2[%c0, %c0_0] : memref<16x32xbf16, #tpu.memory_space<vmem>>, vector<16x32xbf16>
    %c0_1 = arith.constant 0 : index
    %c0_2 = arith.constant 0 : index
    %1 = vector.load %arg3[%c0_1, %c0_2] : memref<32x128xbf16, #tpu.memory_space<vmem>>, vector<32x128xbf16>
    %cst = arith.constant dense<0.000000e+00> : vector<16x128xf32>
    %2 = tpu.matmul %0, %1, %cst {dimension_numbers = #tpu.dot_dimension_numbers<[1], [0], [0], [1], [0, 0, 1, 1], [], []>} : vector<16x32xbf16>, vector<32x128xbf16>, vector<16x128xf32> -> vector<16x128xf32>
    %c0_3 = arith.constant 0 : index
    %c0_4 = arith.constant 0 : index
    %3 = vector.load %arg4[%c0_3, %c0_4] : memref<1x128xf32, #tpu.memory_space<vmem>>, vector<1x128xf32>
    %4 = vector.broadcast %3 : vector<1x128xf32> to vector<16x128xf32>
    %5 = arith.addf %2, %4 : vector<16x128xf32>
    %c0_5 = arith.constant 0 : index
    %c0_6 = arith.constant 0 : index
    %6 = vector.load %arg5[%c0_5, %c0_6] : memref<16x128xf32, #tpu.memory_space<vmem>>, vector<16x128xf32>
    tpu.vector_store %arg5[%c0_5, %c0_6], %5 {strides = array<i32>} : memref<16x128xf32, #tpu.memory_space<vmem>>, vector<16x128xf32>,
    return
  }
  func.func @transform_0(%arg0: i32, %arg1: i32) -> (i32, i32) {
    %c0_i32 = arith.constant 0 : i32
    %c0_i32_0 = arith.constant 0 : i32
    return %arg0, %c0_i32 : i32, i32
  }
  func.func @transform_1(%arg0: i32, %arg1: i32) -> (i32, i32) {
    %c0_i32 = arith.constant 0 : i32
    %c0_i32_0 = arith.constant 0 : i32
    return %c0_i32, %arg1 : i32, i32
  }
  func.func @transform_2(%arg0: i32, %arg1: i32) -> (i32, i32) {
    %c0_i32 = arith.constant 0 : i32
    %c0_i32_0 = arith.constant 0 : i32
    return %c0_i32, %arg1 : i32, i32
  }
  func.func @transform_3(%arg0: i32, %arg1: i32) -> (i32, i32) {
    %c0_i32 = arith.constant 0 : i32
    return %arg0, %arg1 : i32, i32
  }
}

module attributes {stable_mosaic.version = 11 : i64} {
  func.func @_ffn_block_kernel(%arg0: i32, %arg1: memref<16x32xbf16, #tpu.memory_space<vmem>>, %arg2: memref<32x64xbf16, #tpu.memory_space<vmem>>, %arg3: memref<1x64xf32, #tpu.memory_space<vmem>>, %arg4: memref<64x32xbf16, #tpu.memory_space<vmem>>, %arg5: memref<1x32xf32, #tpu.memory_space<vmem>>, %arg6: memref<1x32xf32, #tpu.memory_space<vmem>>, %arg7: memref<1x32xf32, #tpu.memory_space<vmem>>, %arg8: memref<16x32xbf16, #tpu.memory_space<vmem>>) attributes {dimension_semantics = [#tpu.dimension_semantics<parallel>], iteration_bounds = array<i64: 1>, scalar_prefetch = 0 : i64, scratch_operands = 0 : i64, tpu.core_type = #tpu.core_type<tc>, window_params = [{transform_indices = @transform_0, window_bounds = array<i64: 16, 32>}, {pipeline_mode = #tpu.pipeline_mode<synchronous>, transform_indices = @transform_1, window_bounds = array<i64: 32, 64>}, {pipeline_mode = #tpu.pipeline_mode<synchronous>, transform_indices = @transform_2, window_bounds = array<i64: 1, 64>}, {pipeline_mode = #tpu.pipeline_mode<synchronous>, transform_indices = @transform_3, window_bounds = array<i64: 64, 32>}, {pipeline_mode = #tpu.pipeline_mode<synchronous>, transform_indices = @transform_4, window_bounds = array<i64: 1, 32>}, {pipeline_mode = #tpu.pipeline_mode<synchronous>, transform_indices = @transform_5, window_bounds = array<i64: 1, 32>}, {pipeline_mode = #tpu.pipeline_mode<synchronous>, transform_indices = @transform_6, window_bounds = array<i64: 1, 32>}, {transform_indices = @transform_7, window_bounds = array<i64: 16, 32>}]} {
    %c0 = arith.constant 0 : index
    %c0_0 = arith.constant 0 : index
    %0 = vector.load %arg1[%c0, %c0_0] : memref<16x32xbf16, #tpu.memory_space<vmem>>, vector<16x32xbf16>
    %c0_1 = arith.constant 0 : index
    %c0_2 = arith.constant 0 : index
    %1 = vector.load %arg2[%c0_1, %c0_2] : memref<32x64xbf16, #tpu.memory_space<vmem>>, vector<32x64xbf16>
    %cst = arith.constant dense<0.000000e+00> : vector<16x64xf32>
    %2 = tpu.matmul %0, %1, %cst {dimension_numbers = #tpu.dot_dimension_numbers<[1], [0], [0], [1], [0, 0, 1, 1], [], []>} : vector<16x32xbf16>, vector<32x64xbf16>, vector<16x64xf32> -> vector<16x64xf32>
    %c0_3 = arith.constant 0 : index
    %c0_4 = arith.constant 0 : index
    %3 = vector.load %arg3[%c0_3, %c0_4] : memref<1x64xf32, #tpu.memory_space<vmem>>, vector<1x64xf32>
    %4 = vector.broadcast %3 : vector<1x64xf32> to vector<16x64xf32>
    %5 = arith.addf %2, %4 : vector<16x64xf32>
    %cst_5 = arith.constant 0.000000e+00 : f32
    %6 = vector.broadcast %cst_5 : f32 to vector<16x64xf32>
    %7 = arith.maximumf %5, %6 : vector<16x64xf32>
    %8 = arith.truncf %7 : vector<16x64xf32> to vector<16x64xbf16>
    %c0_6 = arith.constant 0 : index
    %c0_7 = arith.constant 0 : index
    %9 = vector.load %arg4[%c0_6, %c0_7] : memref<64x32xbf16, #tpu.memory_space<vmem>>, vector<64x32xbf16>
    %cst_8 = arith.constant dense<0.000000e+00> : vector<16x32xf32>
    %10 = tpu.matmul %8, %9, %cst_8 {dimension_numbers = #tpu.dot_dimension_numbers<[1], [0], [0], [1], [0, 0, 1, 1], [], []>} : vector<16x64xbf16>, vector<64x32xbf16>, vector<16x32xf32> -> vector<16x32xf32>
    %c0_9 = arith.constant 0 : index
    %c0_10 = arith.constant 0 : index
    %11 = vector.load %arg5[%c0_9, %c0_10] : memref<1x32xf32, #tpu.memory_space<vmem>>, vector<1x32xf32>
    %12 = vector.broadcast %11 : vector<1x32xf32> to vector<16x32xf32>
    %13 = arith.addf %10, %12 : vector<16x32xf32>
    %14 = arith.extf %0 : vector<16x32xbf16> to vector<16x32xf32>
    %c0_11 = arith.constant 0 : index
    %c0_12 = arith.constant 0 : index
    %15 = vector.load %arg6[%c0_11, %c0_12] : memref<1x32xf32, #tpu.memory_space<vmem>>, vector<1x32xf32>
    %c0_13 = arith.constant 0 : index
    %c0_14 = arith.constant 0 : index
    %16 = vector.load %arg7[%c0_13, %c0_14] : memref<1x32xf32, #tpu.memory_space<vmem>>, vector<1x32xf32>
    %17 = arith.addf %14, %13 : vector<16x32xf32>
    %cst_15 = arith.constant dense<0.000000e+00> : vector<16xf32>
    %18 = vector.multi_reduction <add>, %17, %cst_15 [1] : vector<16x32xf32> to vector<16xf32>
    %19 = vector.shape_cast %18 : vector<16xf32> to vector<16x1xf32>
    %cst_16 = arith.constant 3.200000e+01 : f32
    %20 = vector.broadcast %cst_16 : f32 to vector<16x1xf32>
    %21 = arith.divf %19, %20 : vector<16x1xf32>
    %22 = vector.broadcast %21 : vector<16x1xf32> to vector<16x32xf32>
    %23 = arith.subf %17, %22 : vector<16x32xf32>
    %24 = arith.mulf %23, %23 : vector<16x32xf32>
    %cst_17 = arith.constant dense<0.000000e+00> : vector<16xf32>
    %25 = vector.multi_reduction <add>, %24, %cst_17 [1] : vector<16x32xf32> to vector<16xf32>
    %26 = vector.shape_cast %25 : vector<16xf32> to vector<16x1xf32>
    %cst_18 = arith.constant 3.200000e+01 : f32
    %27 = vector.broadcast %cst_18 : f32 to vector<16x1xf32>
    %28 = arith.divf %26, %27 : vector<16x1xf32>
    %29 = vector.broadcast %21 : vector<16x1xf32> to vector<16x32xf32>
    %30 = arith.subf %17, %29 : vector<16x32xf32>
    %cst_19 = arith.constant 9.99999974E-6 : f32
    %31 = vector.broadcast %cst_19 : f32 to vector<16x1xf32>
    %32 = arith.addf %28, %31 : vector<16x1xf32>
    %33 = math.rsqrt %32 : vector<16x1xf32>
    %34 = vector.broadcast %33 : vector<16x1xf32> to vector<16x32xf32>
    %35 = arith.mulf %30, %34 : vector<16x32xf32>
    %36 = vector.broadcast %15 : vector<1x32xf32> to vector<16x32xf32>
    %37 = arith.mulf %35, %36 : vector<16x32xf32>
    %38 = vector.broadcast %16 : vector<1x32xf32> to vector<16x32xf32>
    %39 = arith.addf %37, %38 : vector<16x32xf32>
    %40 = arith.truncf %39 : vector<16x32xf32> to vector<16x32xbf16>
    %c0_20 = arith.constant 0 : index
    %c0_21 = arith.constant 0 : index
    %41 = vector.load %arg8[%c0_20, %c0_21] : memref<16x32xbf16, #tpu.memory_space<vmem>>, vector<16x32xbf16>
    tpu.vector_store %arg8[%c0_20, %c0_21], %40 {strides = array<i32>} : memref<16x32xbf16, #tpu.memory_space<vmem>>, vector<16x32xbf16>,
    return
  }
  func.func @transform_0(%arg0: i32) -> (i32, i32) {
    %c0_i32 = arith.constant 0 : i32
    %c0_i32_0 = arith.constant 0 : i32
    return %arg0, %c0_i32 : i32, i32
  }
  func.func @transform_1(%arg0: i32) -> (i32, i32) {
    %c0_i32 = arith.constant 0 : i32
    %c0_i32_0 = arith.constant 0 : i32
    %c0_i32_1 = arith.constant 0 : i32
    return %c0_i32, %c0_i32_0 : i32, i32
  }
  func.func @transform_2(%arg0: i32) -> (i32, i32) {
    %c0_i32 = arith.constant 0 : i32
    %c0_i32_0 = arith.constant 0 : i32
    %c0_i32_1 = arith.constant 0 : i32
    return %c0_i32, %c0_i32_0 : i32, i32
  }
  func.func @transform_3(%arg0: i32) -> (i32, i32) {
    %c0_i32 = arith.constant 0 : i32
    %c0_i32_0 = arith.constant 0 : i32
    %c0_i32_1 = arith.constant 0 : i32
    return %c0_i32, %c0_i32_0 : i32, i32
  }
  func.func @transform_4(%arg0: i32) -> (i32, i32) {
    %c0_i32 = arith.constant 0 : i32
    %c0_i32_0 = arith.constant 0 : i32
    %c0_i32_1 = arith.constant 0 : i32
    return %c0_i32, %c0_i32_0 : i32, i32
  }
  func.func @transform_5(%arg0: i32) -> (i32, i32) {
    %c0_i32 = arith.constant 0 : i32
    %c0_i32_0 = arith.constant 0 : i32
    %c0_i32_1 = arith.constant 0 : i32
    return %c0_i32, %c0_i32_0 : i32, i32
  }
  func.func @transform_6(%arg0: i32) -> (i32, i32) {
    %c0_i32 = arith.constant 0 : i32
    %c0_i32_0 = arith.constant 0 : i32
    %c0_i32_1 = arith.constant 0 : i32
    return %c0_i32, %c0_i32_0 : i32, i32
  }
  func.func @transform_7(%arg0: i32) -> (i32, i32) {
    %c0_i32 = arith.constant 0 : i32
    %c0_i32_0 = arith.constant 0 : i32
    return %arg0, %c0_i32 : i32, i32
  }
}

module attributes {stable_mosaic.version = 11 : i64} {
  func.func @_attn_block_kernel(%arg0: i32, %arg1: i32, %arg2: memref<1x8x32xbf16, #tpu.memory_space<vmem>>, %arg3: memref<1x10x32xbf16, #tpu.memory_space<vmem>>, %arg4: memref<32x32xbf16, #tpu.memory_space<vmem>>, %arg5: memref<1x32xf32, #tpu.memory_space<vmem>>, %arg6: memref<32x64xbf16, #tpu.memory_space<vmem>>, %arg7: memref<1x64xf32, #tpu.memory_space<vmem>>, %arg8: memref<32x32xbf16, #tpu.memory_space<vmem>>, %arg9: memref<1x32xf32, #tpu.memory_space<vmem>>, %arg10: memref<1x32xf32, #tpu.memory_space<vmem>>, %arg11: memref<1x32xf32, #tpu.memory_space<vmem>>, %arg12: memref<1x8x32xbf16, #tpu.memory_space<vmem>>) attributes {dimension_semantics = [#tpu.dimension_semantics<parallel>, #tpu.dimension_semantics<parallel>], iteration_bounds = array<i64: 2, 1>, scalar_prefetch = 0 : i64, scratch_operands = 0 : i64, tpu.core_type = #tpu.core_type<tc>, window_params = [{transform_indices = @transform_0, window_bounds = array<i64: 1, 8, 32>}, {transform_indices = @transform_1, window_bounds = array<i64: 1, 10, 32>}, {pipeline_mode = #tpu.pipeline_mode<synchronous>, transform_indices = @transform_2, window_bounds = array<i64: 32, 32>}, {pipeline_mode = #tpu.pipeline_mode<synchronous>, transform_indices = @transform_3, window_bounds = array<i64: 1, 32>}, {pipeline_mode = #tpu.pipeline_mode<synchronous>, transform_indices = @transform_4, window_bounds = array<i64: 32, 64>}, {pipeline_mode = #tpu.pipeline_mode<synchronous>, transform_indices = @transform_5, window_bounds = array<i64: 1, 64>}, {pipeline_mode = #tpu.pipeline_mode<synchronous>, transform_indices = @transform_6, window_bounds = array<i64: 32, 32>}, {pipeline_mode = #tpu.pipeline_mode<synchronous>, transform_indices = @transform_7, window_bounds = array<i64: 1, 32>}, {pipeline_mode = #tpu.pipeline_mode<synchronous>, transform_indices = @transform_8, window_bounds = array<i64: 1, 32>}, {pipeline_mode = #tpu.pipeline_mode<synchronous>, transform_indices = @transform_9, window_bounds = array<i64: 1, 32>}, {transform_indices = @transform_10, window_bounds = array<i64: 1, 8, 32>}]} {
    %c0 = arith.constant 0 : index
    %c0_0 = arith.constant 0 : index
    %c0_1 = arith.constant 0 : index
    %0 = vector.load %arg2[%c0, %c0_0, %c0_1] : memref<1x8x32xbf16, #tpu.memory_space<vmem>>, vector<1x8x32xbf16>
    %1 = vector.shape_cast %0 : vector<1x8x32xbf16> to vector<8x32xbf16>
    %c0_2 = arith.constant 0 : index
    %c0_3 = arith.constant 0 : index
    %c0_4 = arith.constant 0 : index
    %2 = vector.load %arg3[%c0_2, %c0_3, %c0_4] : memref<1x10x32xbf16, #tpu.memory_space<vmem>>, vector<1x10x32xbf16>
    %3 = vector.shape_cast %2 : vector<1x10x32xbf16> to vector<10x32xbf16>
    %c0_5 = arith.constant 0 : index
    %c0_6 = arith.constant 0 : index
    %4 = vector.load %arg4[%c0_5, %c0_6] : memref<32x32xbf16, #tpu.memory_space<vmem>>, vector<32x32xbf16>
    %cst = arith.constant dense<0.000000e+00> : vector<8x32xf32>
    %5 = tpu.matmul %1, %4, %cst {dimension_numbers = #tpu.dot_dimension_numbers<[1], [0], [0], [1], [0, 0, 1, 1], [], []>} : vector<8x32xbf16>, vector<32x32xbf16>, vector<8x32xf32> -> vector<8x32xf32>
    %c0_7 = arith.constant 0 : index
    %c0_8 = arith.constant 0 : index
    %6 = vector.load %arg5[%c0_7, %c0_8] : memref<1x32xf32, #tpu.memory_space<vmem>>, vector<1x32xf32>
    %7 = vector.broadcast %6 : vector<1x32xf32> to vector<8x32xf32>
    %8 = arith.addf %5, %7 : vector<8x32xf32>
    %c0_9 = arith.constant 0 : index
    %c0_10 = arith.constant 0 : index
    %9 = vector.load %arg6[%c0_9, %c0_10] : memref<32x64xbf16, #tpu.memory_space<vmem>>, vector<32x64xbf16>
    %cst_11 = arith.constant dense<0.000000e+00> : vector<10x64xf32>
    %10 = tpu.matmul %3, %9, %cst_11 {dimension_numbers = #tpu.dot_dimension_numbers<[1], [0], [0], [1], [0, 0, 1, 1], [], []>} : vector<10x32xbf16>, vector<32x64xbf16>, vector<10x64xf32> -> vector<10x64xf32>
    %c0_12 = arith.constant 0 : index
    %c0_13 = arith.constant 0 : index
    %11 = vector.load %arg7[%c0_12, %c0_13] : memref<1x64xf32, #tpu.memory_space<vmem>>, vector<1x64xf32>
    %12 = vector.broadcast %11 : vector<1x64xf32> to vector<10x64xf32>
    %13 = arith.addf %10, %12 : vector<10x64xf32>
    %14 = vector.extract_strided_slice %13 {offsets = [0, 0], sizes = [10, 32], strides = [1, 1]} : vector<10x64xf32> to vector<10x32xf32>
    %15 = vector.extract_strided_slice %13 {offsets = [0, 32], sizes = [10, 32], strides = [1, 1]} : vector<10x64xf32> to vector<10x32xf32>
    %c0_14 = arith.constant 0 : index
    %c0_15 = arith.constant 0 : index
    %16 = vector.load %arg8[%c0_14, %c0_15] : memref<32x32xbf16, #tpu.memory_space<vmem>>, vector<32x32xbf16>
    %cst_16 = arith.constant 0.000000e+00 : f32
    %17 = vector.broadcast %cst_16 : f32 to vector<8x32xf32>
    %18 = vector.extract_strided_slice %8 {offsets = [0, 0], sizes = [8, 8], strides = [1, 1]} : vector<8x32xf32> to vector<8x8xf32>
    %19 = arith.truncf %18 : vector<8x8xf32> to vector<8x8xbf16>
    %20 = vector.extract_strided_slice %14 {offsets = [0, 0], sizes = [10, 8], strides = [1, 1]} : vector<10x32xf32> to vector<10x8xf32>
    %21 = arith.truncf %20 : vector<10x8xf32> to vector<10x8xbf16>
    %22 = vector.extract_strided_slice %15 {offsets = [0, 0], sizes = [10, 8], strides = [1, 1]} : vector<10x32xf32> to vector<10x8xf32>
    %23 = arith.truncf %22 : vector<10x8xf32> to vector<10x8xbf16>
    %cst_17 = arith.constant dense<0.000000e+00> : vector<8x10xf32>
    %24 = tpu.matmul %19, %21, %cst_17 {dimension_numbers = #tpu.dot_dimension_numbers<[1], [1], [0], [0], [0, 0, 1, 0], [], []>} : vector<8x8xbf16>, vector<10x8xbf16>, vector<8x10xf32> -> vector<8x10xf32>
    %cst_18 = arith.constant dense<0xFF800000> : vector<8xf32>
    %25 = vector.multi_reduction <maximumf>, %24, %cst_18 [1] : vector<8x10xf32> to vector<8xf32>
    %26 = vector.shape_cast %25 : vector<8xf32> to vector<8x1xf32>
    %27 = vector.broadcast %26 : vector<8x1xf32> to vector<8x10xf32>
    %28 = arith.subf %24, %27 : vector<8x10xf32>
    %29 = math.exp %28 : vector<8x10xf32>
    %cst_19 = arith.constant dense<0.000000e+00> : vector<8xf32>
    %30 = vector.multi_reduction <add>, %29, %cst_19 [1] : vector<8x10xf32> to vector<8xf32>
    %31 = vector.shape_cast %30 : vector<8xf32> to vector<8x1xf32>
    %32 = tpu.reciprocal %31 {approx = true} : vector<8x1xf32> -> vector<8x1xf32>
    %33 = vector.broadcast %32 : vector<8x1xf32> to vector<8x10xf32>
    %34 = arith.mulf %29, %33 : vector<8x10xf32>
    %35 = arith.truncf %34 : vector<8x10xf32> to vector<8x10xbf16>
    %cst_20 = arith.constant dense<0.000000e+00> : vector<8x8xf32>
    %36 = tpu.matmul %35, %23, %cst_20 {dimension_numbers = #tpu.dot_dimension_numbers<[1], [0], [0], [1], [0, 0, 1, 1], [], []>} : vector<8x10xbf16>, vector<10x8xbf16>, vector<8x8xf32> -> vector<8x8xf32>
    %37 = arith.truncf %36 : vector<8x8xf32> to vector<8x8xbf16>
    %38 = vector.extract_strided_slice %16 {offsets = [0, 0], sizes = [8, 32], strides = [1, 1]} : vector<32x32xbf16> to vector<8x32xbf16>
    %cst_21 = arith.constant dense<0.000000e+00> : vector<8x32xf32>
    %39 = tpu.matmul %37, %38, %cst_21 {dimension_numbers = #tpu.dot_dimension_numbers<[1], [0], [0], [1], [0, 0, 1, 1], [], []>} : vector<8x8xbf16>, vector<8x32xbf16>, vector<8x32xf32> -> vector<8x32xf32>
    %40 = arith.addf %17, %39 : vector<8x32xf32>
    %41 = vector.extract_strided_slice %8 {offsets = [0, 8], sizes = [8, 8], strides = [1, 1]} : vector<8x32xf32> to vector<8x8xf32>
    %42 = arith.truncf %41 : vector<8x8xf32> to vector<8x8xbf16>
    %43 = vector.extract_strided_slice %14 {offsets = [0, 8], sizes = [10, 8], strides = [1, 1]} : vector<10x32xf32> to vector<10x8xf32>
    %44 = arith.truncf %43 : vector<10x8xf32> to vector<10x8xbf16>
    %45 = vector.extract_strided_slice %15 {offsets = [0, 8], sizes = [10, 8], strides = [1, 1]} : vector<10x32xf32> to vector<10x8xf32>
    %46 = arith.truncf %45 : vector<10x8xf32> to vector<10x8xbf16>
    %cst_22 = arith.constant dense<0.000000e+00> : vector<8x10xf32>
    %47 = tpu.matmul %42, %44, %cst_22 {dimension_numbers = #tpu.dot_dimension_numbers<[1], [1], [0], [0], [0, 0, 1, 0], [], []>} : vector<8x8xbf16>, vector<10x8xbf16>, vector<8x10xf32> -> vector<8x10xf32>
    %cst_23 = arith.constant dense<0xFF800000> : vector<8xf32>
    %48 = vector.multi_reduction <maximumf>, %47, %cst_23 [1] : vector<8x10xf32> to vector<8xf32>
    %49 = vector.shape_cast %48 : vector<8xf32> to vector<8x1xf32>
    %50 = vector.broadcast %49 : vector<8x1xf32> to vector<8x10xf32>
    %51 = arith.subf %47, %50 : vector<8x10xf32>
    %52 = math.exp %51 : vector<8x10xf32>
    %cst_24 = arith.constant dense<0.000000e+00> : vector<8xf32>
    %53 = vector.multi_reduction <add>, %52, %cst_24 [1] : vector<8x10xf32> to vector<8xf32>
    %54 = vector.shape_cast %53 : vector<8xf32> to vector<8x1xf32>
    %55 = tpu.reciprocal %54 {approx = true} : vector<8x1xf32> -> vector<8x1xf32>
    %56 = vector.broadcast %55 : vector<8x1xf32> to vector<8x10xf32>
    %57 = arith.mulf %52, %56 : vector<8x10xf32>
    %58 = arith.truncf %57 : vector<8x10xf32> to vector<8x10xbf16>
    %cst_25 = arith.constant dense<0.000000e+00> : vector<8x8xf32>
    %59 = tpu.matmul %58, %46, %cst_25 {dimension_numbers = #tpu.dot_dimension_numbers<[1], [0], [0], [1], [0, 0, 1, 1], [], []>} : vector<8x10xbf16>, vector<10x8xbf16>, vector<8x8xf32> -> vector<8x8xf32>
    %60 = arith.truncf %59 : vector<8x8xf32> to vector<8x8xbf16>
    %61 = vector.extract_strided_slice %16 {offsets = [8, 0], sizes = [8, 32], strides = [1, 1]} : vector<32x32xbf16> to vector<8x32xbf16>
    %cst_26 = arith.constant dense<0.000000e+00> : vector<8x32xf32>
    %62 = tpu.matmul %60, %61, %cst_26 {dimension_numbers = #tpu.dot_dimension_numbers<[1], [0], [0], [1], [0, 0, 1, 1], [], []>} : vector<8x8xbf16>, vector<8x32xbf16>, vector<8x32xf32> -> vector<8x32xf32>
    %63 = arith.addf %40, %62 : vector<8x32xf32>
    %64 = vector.extract_strided_slice %8 {offsets = [0, 16], sizes = [8, 8], strides = [1, 1]} : vector<8x32xf32> to vector<8x8xf32>
    %65 = arith.truncf %64 : vector<8x8xf32> to vector<8x8xbf16>
    %66 = vector.extract_strided_slice %14 {offsets = [0, 16], sizes = [10, 8], strides = [1, 1]} : vector<10x32xf32> to vector<10x8xf32>
    %67 = arith.truncf %66 : vector<10x8xf32> to vector<10x8xbf16>
    %68 = vector.extract_strided_slice %15 {offsets = [0, 16], sizes = [10, 8], strides = [1, 1]} : vector<10x32xf32> to vector<10x8xf32>
    %69 = arith.truncf %68 : vector<10x8xf32> to vector<10x8xbf16>
    %cst_27 = arith.constant dense<0.000000e+00> : vector<8x10xf32>
    %70 = tpu.matmul %65, %67, %cst_27 {dimension_numbers = #tpu.dot_dimension_numbers<[1], [1], [0], [0], [0, 0, 1, 0], [], []>} : vector<8x8xbf16>, vector<10x8xbf16>, vector<8x10xf32> -> vector<8x10xf32>
    %cst_28 = arith.constant dense<0xFF800000> : vector<8xf32>
    %71 = vector.multi_reduction <maximumf>, %70, %cst_28 [1] : vector<8x10xf32> to vector<8xf32>
    %72 = vector.shape_cast %71 : vector<8xf32> to vector<8x1xf32>
    %73 = vector.broadcast %72 : vector<8x1xf32> to vector<8x10xf32>
    %74 = arith.subf %70, %73 : vector<8x10xf32>
    %75 = math.exp %74 : vector<8x10xf32>
    %cst_29 = arith.constant dense<0.000000e+00> : vector<8xf32>
    %76 = vector.multi_reduction <add>, %75, %cst_29 [1] : vector<8x10xf32> to vector<8xf32>
    %77 = vector.shape_cast %76 : vector<8xf32> to vector<8x1xf32>
    %78 = tpu.reciprocal %77 {approx = true} : vector<8x1xf32> -> vector<8x1xf32>
    %79 = vector.broadcast %78 : vector<8x1xf32> to vector<8x10xf32>
    %80 = arith.mulf %75, %79 : vector<8x10xf32>
    %81 = arith.truncf %80 : vector<8x10xf32> to vector<8x10xbf16>
    %cst_30 = arith.constant dense<0.000000e+00> : vector<8x8xf32>
    %82 = tpu.matmul %81, %69, %cst_30 {dimension_numbers = #tpu.dot_dimension_numbers<[1], [0], [0], [1], [0, 0, 1, 1], [], []>} : vector<8x10xbf16>, vector<10x8xbf16>, vector<8x8xf32> -> vector<8x8xf32>
    %83 = arith.truncf %82 : vector<8x8xf32> to vector<8x8xbf16>
    %84 = vector.extract_strided_slice %16 {offsets = [16, 0], sizes = [8, 32], strides = [1, 1]} : vector<32x32xbf16> to vector<8x32xbf16>
    %cst_31 = arith.constant dense<0.000000e+00> : vector<8x32xf32>
    %85 = tpu.matmul %83, %84, %cst_31 {dimension_numbers = #tpu.dot_dimension_numbers<[1], [0], [0], [1], [0, 0, 1, 1], [], []>} : vector<8x8xbf16>, vector<8x32xbf16>, vector<8x32xf32> -> vector<8x32xf32>
    %86 = arith.addf %63, %85 : vector<8x32xf32>
    %87 = vector.extract_strided_slice %8 {offsets = [0, 24], sizes = [8, 8], strides = [1, 1]} : vector<8x32xf32> to vector<8x8xf32>
    %88 = arith.truncf %87 : vector<8x8xf32> to vector<8x8xbf16>
    %89 = vector.extract_strided_slice %14 {offsets = [0, 24], sizes = [10, 8], strides = [1, 1]} : vector<10x32xf32> to vector<10x8xf32>
    %90 = arith.truncf %89 : vector<10x8xf32> to vector<10x8xbf16>
    %91 = vector.extract_strided_slice %15 {offsets = [0, 24], sizes = [10, 8], strides = [1, 1]} : vector<10x32xf32> to vector<10x8xf32>
    %92 = arith.truncf %91 : vector<10x8xf32> to vector<10x8xbf16>
    %cst_32 = arith.constant dense<0.000000e+00> : vector<8x10xf32>
    %93 = tpu.matmul %88, %90, %cst_32 {dimension_numbers = #tpu.dot_dimension_numbers<[1], [1], [0], [0], [0, 0, 1, 0], [], []>} : vector<8x8xbf16>, vector<10x8xbf16>, vector<8x10xf32> -> vector<8x10xf32>
    %cst_33 = arith.constant dense<0xFF800000> : vector<8xf32>
    %94 = vector.multi_reduction <maximumf>, %93, %cst_33 [1] : vector<8x10xf32> to vector<8xf32>
    %95 = vector.shape_cast %94 : vector<8xf32> to vector<8x1xf32>
    %96 = vector.broadcast %95 : vector<8x1xf32> to vector<8x10xf32>
    %97 = arith.subf %93, %96 : vector<8x10xf32>
    %98 = math.exp %97 : vector<8x10xf32>
    %cst_34 = arith.constant dense<0.000000e+00> : vector<8xf32>
    %99 = vector.multi_reduction <add>, %98, %cst_34 [1] : vector<8x10xf32> to vector<8xf32>
    %100 = vector.shape_cast %99 : vector<8xf32> to vector<8x1xf32>
    %101 = tpu.reciprocal %100 {approx = true} : vector<8x1xf32> -> vector<8x1xf32>
    %102 = vector.broadcast %101 : vector<8x1xf32> to vector<8x10xf32>
    %103 = arith.mulf %98, %102 : vector<8x10xf32>
    %104 = arith.truncf %103 : vector<8x10xf32> to vector<8x10xbf16>
    %cst_35 = arith.constant dense<0.000000e+00> : vector<8x8xf32>
    %105 = tpu.matmul %104, %92, %cst_35 {dimension_numbers = #tpu.dot_dimension_numbers<[1], [0], [0], [1], [0, 0, 1, 1], [], []>} : vector<8x10xbf16>, vector<10x8xbf16>, vector<8x8xf32> -> vector<8x8xf32>
    %106 = arith.truncf %105 : vector<8x8xf32> to vector<8x8xbf16>
    %107 = vector.extract_strided_slice %16 {offsets = [24, 0], sizes = [8, 32], strides = [1, 1]} : vector<32x32xbf16> to vector<8x32xbf16>
    %cst_36 = arith.constant dense<0.000000e+00> : vector<8x32xf32>
    %108 = tpu.matmul %106, %107, %cst_36 {dimension_numbers = #tpu.dot_dimension_numbers<[1], [0], [0], [1], [0, 0, 1, 1], [], []>} : vector<8x8xbf16>, vector<8x32xbf16>, vector<8x32xf32> -> vector<8x32xf32>
    %109 = arith.addf %86, %108 : vector<8x32xf32>
    %c0_37 = arith.constant 0 : index
    %c0_38 = arith.constant 0 : index
    %110 = vector.load %arg9[%c0_37, %c0_38] : memref<1x32xf32, #tpu.memory_space<vmem>>, vector<1x32xf32>
    %111 = vector.broadcast %110 : vector<1x32xf32> to vector<8x32xf32>
    %112 = arith.addf %109, %111 : vector<8x32xf32>
    %113 = arith.extf %1 : vector<8x32xbf16> to vector<8x32xf32>
    %c0_39 = arith.constant 0 : index
    %c0_40 = arith.constant 0 : index
    %114 = vector.load %arg10[%c0_39, %c0_40] : memref<1x32xf32, #tpu.memory_space<vmem>>, vector<1x32xf32>
    %c0_41 = arith.constant 0 : index
    %c0_42 = arith.constant 0 : index
    %115 = vector.load %arg11[%c0_41, %c0_42] : memref<1x32xf32, #tpu.memory_space<vmem>>, vector<1x32xf32>
    %116 = arith.addf %113, %112 : vector<8x32xf32>
    %cst_43 = arith.constant dense<0.000000e+00> : vector<8xf32>
    %117 = vector.multi_reduction <add>, %116, %cst_43 [1] : vector<8x32xf32> to vector<8xf32>
    %118 = vector.shape_cast %117 : vector<8xf32> to vector<8x1xf32>
    %cst_44 = arith.constant 3.200000e+01 : f32
    %119 = vector.broadcast %cst_44 : f32 to vector<8x1xf32>
    %120 = arith.divf %118, %119 : vector<8x1xf32>
    %121 = vector.broadcast %120 : vector<8x1xf32> to vector<8x32xf32>
    %122 = arith.subf %116, %121 : vector<8x32xf32>
    %123 = arith.mulf %122, %122 : vector<8x32xf32>
    %cst_45 = arith.constant dense<0.000000e+00> : vector<8xf32>
    %124 = vector.multi_reduction <add>, %123, %cst_45 [1] : vector<8x32xf32> to vector<8xf32>
    %125 = vector.shape_cast %124 : vector<8xf32> to vector<8x1xf32>
    %cst_46 = arith.constant 3.200000e+01 : f32
    %126 = vector.broadcast %cst_46 : f32 to vector<8x1xf32>
    %127 = arith.divf %125, %126 : vector<8x1xf32>
    %128 = vector.broadcast %120 : vector<8x1xf32> to vector<8x32xf32>
    %129 = arith.subf %116, %128 : vector<8x32xf32>
    %cst_47 = arith.constant 9.99999974E-6 : f32
    %130 = vector.broadcast %cst_47 : f32 to vector<8x1xf32>
    %131 = arith.addf %127, %130 : vector<8x1xf32>
    %132 = math.rsqrt %131 : vector<8x1xf32>
    %133 = vector.broadcast %132 : vector<8x1xf32> to vector<8x32xf32>
    %134 = arith.mulf %129, %133 : vector<8x32xf32>
    %135 = vector.broadcast %114 : vector<1x32xf32> to vector<8x32xf32>
    %136 = arith.mulf %134, %135 : vector<8x32xf32>
    %137 = vector.broadcast %115 : vector<1x32xf32> to vector<8x32xf32>
    %138 = arith.addf %136, %137 : vector<8x32xf32>
    %139 = arith.truncf %138 : vector<8x32xf32> to vector<8x32xbf16>
    %c0_48 = arith.constant 0 : index
    %c0_49 = arith.constant 0 : index
    %c0_50 = arith.constant 0 : index
    %140 = vector.load %arg12[%c0_48, %c0_49, %c0_50] : memref<1x8x32xbf16, #tpu.memory_space<vmem>>, vector<1x8x32xbf16>
    %141 = vector.shape_cast %140 : vector<1x8x32xbf16> to vector<8x32xbf16>
    %142 = vector.shape_cast %139 : vector<8x32xbf16> to vector<1x8x32xbf16>
    tpu.vector_store %arg12[%c0_48, %c0_49, %c0_50], %142 {strides = array<i32>} : memref<1x8x32xbf16, #tpu.memory_space<vmem>>, vector<1x8x32xbf16>,
    return
  }
  func.func @transform_0(%arg0: i32, %arg1: i32) -> (i32, i32, i32) {
    %c0_i32 = arith.constant 0 : i32
    %c0_i32_0 = arith.constant 0 : i32
    return %arg0, %arg1, %c0_i32 : i32, i32, i32
  }
  func.func @transform_1(%arg0: i32, %arg1: i32) -> (i32, i32, i32) {
    %c0_i32 = arith.constant 0 : i32
    %c0_i32_0 = arith.constant 0 : i32
    %c0_i32_1 = arith.constant 0 : i32
    return %arg0, %c0_i32, %c0_i32_0 : i32, i32, i32
  }
  func.func @transform_2(%arg0: i32, %arg1: i32) -> (i32, i32) {
    %c0_i32 = arith.constant 0 : i32
    %c0_i32_0 = arith.constant 0 : i32
    %c0_i32_1 = arith.constant 0 : i32
    return %c0_i32, %c0_i32_0 : i32, i32
  }
  func.func @transform_3(%arg0: i32, %arg1: i32) -> (i32, i32) {
    %c0_i32 = arith.constant 0 : i32
    %c0_i32_0 = arith.constant 0 : i32
    %c0_i32_1 = arith.constant 0 : i32
    return %c0_i32, %c0_i32_0 : i32, i32
  }
  func.func @transform_4(%arg0: i32, %arg1: i32) -> (i32, i32) {
    %c0_i32 = arith.constant 0 : i32
    %c0_i32_0 = arith.constant 0 : i32
    %c0_i32_1 = arith.constant 0 : i32
    return %c0_i32, %c0_i32_0 : i32, i32
  }
  func.func @transform_5(%arg0: i32, %arg1: i32) -> (i32, i32) {
    %c0_i32 = arith.constant 0 : i32
    %c0_i32_0 = arith.constant 0 : i32
    %c0_i32_1 = arith.constant 0 : i32
    return %c0_i32, %c0_i32_0 : i32, i32
  }
  func.func @transform_6(%arg0: i32, %arg1: i32) -> (i32, i32) {
    %c0_i32 = arith.constant 0 : i32
    %c0_i32_0 = arith.constant 0 : i32
    %c0_i32_1 = arith.constant 0 : i32
    return %c0_i32, %c0_i32_0 : i32, i32
  }
  func.func @transform_7(%arg0: i32, %arg1: i32) -> (i32, i32) {
    %c0_i32 = arith.constant 0 : i32
    %c0_i32_0 = arith.constant 0 : i32
    %c0_i32_1 = arith.constant 0 : i32
    return %c0_i32, %c0_i32_0 : i32, i32
  }
  func.func @transform_8(%arg0: i32, %arg1: i32) -> (i32, i32) {
    %c0_i32 = arith.constant 0 : i32
    %c0_i32_0 = arith.constant 0 : i32
    %c0_i32_1 = arith.constant 0 : i32
    return %c0_i32, %c0_i32_0 : i32, i32
  }
  func.func @transform_9(%arg0: i32, %arg1: i32) -> (i32, i32) {
    %c0_i32 = arith.constant 0 : i32
    %c0_i32_0 = arith.constant 0 : i32
    %c0_i32_1 = arith.constant 0 : i32
    return %c0_i32, %c0_i32_0 : i32, i32
  }
  func.func @transform_10(%arg0: i32, %arg1: i32) -> (i32, i32, i32) {
    %c0_i32 = arith.constant 0 : i32
    %c0_i32_0 = arith.constant 0 : i32
    return %arg0, %arg1, %c0_i32 : i32, i32, i32
  }
}

</mosaic_0001>

<bundles_post_ra>
// kernel: transformer_decoder.9
= control target key start
LH: loop header
LB: loop body
LE: loop exit
PB: predicated region body
PF: predicated region fallthrough
CT: control target
= control target key end

     0   :  { %v312_v0 = vmov 0.0   ;;  %vm313_vm0 = vmmov 0   ;;  %vm57_vm1 = vcmask 261120   ;;  %vm144_vm2 = vcmask 523264   ;;  %s398_s1 = inlined_call_operand.vmem [shape: bf16[32,64], index: 1, kind: input, shape index: {}]   ;;  %s399_s0 = inlined_call_operand.vmem [shape: bf16[16,32], index: 0, kind: input, shape index: {}]   ;;  %s400_s3 = inlined_call_operand.vmem [shape: bf16[64,32], index: 3, kind: input, shape index: {}]   ;;  %s401_s2 = inlined_call_operand.vmem [shape: f32[1,64], index: 2, kind: input, shape index: {}]   ;;  %s402_s4 = inlined_call_operand.vmem [shape: f32[1,32], index: 4, kind: input, shape index: {}]   ;;  %s403_s5 = inlined_call_operand.vmem [shape: f32[1,32], index: 5, kind: input, shape index: {}]   ;;  %s404_s6 = inlined_call_operand.vmem [shape: f32[1,32], index: 6, kind: input, shape index: {}]   ;;  %s405_s7 = inlined_call_operand.vmem [shape: bf16[16,32], index: 7, kind: output, shape index: {}]  }
   0x1   :  { %278 = vmatprep.subr.bf16.mxu0 %v312_v0  ;;  %v300_v1 = vld [vmem:[%s398_s1] sm:$0xff]   ;;  %282 = vmatprep.mubr.msk.bf16.mxu0 %vm313_vm0, %v312_v0  ;;  %v301_v2 = vld [vmem:[%s398_s1 + $0x8] sm:$0xff]   ;;  %v305_v6 = vld [vmem:[%s400_s3 + $0x10] sm:$0xff]   ;;  %vm246_vm3 = vcmask 257024  }
   0x2   :  { %286 = vmatprep.subr.bf16.mxu1 %v312_v0  ;;  %294 = vmatprep.mubr.msk.bf16.mxu1 %vm313_vm0, %v312_v0  ;;  %v27_v3 = vld [vmem:[%s399_s0] sm:$0xff]   ;;  %v304_v5 = vld [vmem:[%s400_s3 + $0x8] sm:$0xff]   ;;  %v306_v7 = vld [vmem:[%s400_s3 + $0x18] sm:$0xff]  }
   0x3   :  { %279 = vmatpush3.bf16.msra.mxu0 %v300_v1  ;;  %v303_v4 = vld [vmem:[%s400_s3] sm:$0xff]   ;;  %v189_v19 = vunpack.c.l.bf16 %v27_v3  ;;  %v190_v23 = vunpack.c.h.bf16 %v27_v3 }
   0x4   :  { %280 = vmatprep.subr.bf16.mxu0 %v312_v0  ;;  %287 = vmatpush3.bf16.msra.mxu1 %v303_v4  ;;  %v253_v8 = vld [vmem:[%s401_s2] ss:$0 sm:$0xff] }
   0x5   :  { %288 = vmatprep.subr.bf16.mxu1 %v312_v0  ;;  %v258_v18 = vld [vmem:[%s402_s4] ss:$0 sm:$0xff] }
   0x6   :  { %v264_v48 = vld [vmem:[%s403_s5] ss:$0 sm:$0xff] }
   0x7   :  { %281 = vmatpush3.bf16.msra.mxu0 %v301_v2  ;;  %v265_v50 = vld [vmem:[%s404_s6] ss:$0 sm:$0xff] }
   0x8   :  { %289 = vmatpush3.bf16.msra.mxu1 %v304_v5 }
   0x9   :  { %290 = vmatprep.subr.bf16.mxu1 %v312_v0 }
   0xa   :  { %283 = vmatmul.mubr.msk.bf16.vlgmr.msra.gmra.mrb[0].mxu0 %vm57_vm1, %v27_v3 }
   0xc   :  { %291 = vmatpush3.bf16.msra.mxu1 %v305_v6 }
   0xd   :  { %292 = vmatprep.subr.bf16.mxu1 %v312_v0 }
  0x10   :  { %293 = vmatpush3.bf16.msra.mxu1 %v306_v7 }
  0xdd   :  { %v95_v9 = vpop.f32.mrb[0].mxu0 }
  0xde   :  { %v96_v10 = vadd.f32 %v253_v8, %v95_v9  ;;  %v284_v11 = vpop.f32.mrb[1].mxu0 }
  0xdf   :  { %v98_v12 = vpop.f32.mrb[2].mxu0 }
  0xe0   :  { %v99_v13 = vadd.f32 %v253_v8, %v98_v12  ;;  %v285_v14 = vpop.f32.mrb[3].mxu0  ;;  %v102_v15 = vmax.f32 %v96_v10, 0.0 }
  0xe2   :  { %v103_v16 = vmax.f32 %v99_v13, 0.0 }
  0xe4   :  { %v104_v17 = vpack.c.bf16 %v103_v16, %v102_v15 }
  0xe6   :  { %295 = vmatmul.mubr.msk.bf16.vlgmr.msra.gmra.mrb[0].mxu1 %vm144_vm2, %v104_v17 }
 0x1b9   :  { %v182_v20 = vpop.f32.mrb[0].mxu1 }
 0x1ba   :  { %v183_v21 = vadd.f32 %v258_v18, %v182_v20  ;;  %v296_v22 = vpop.f32.mrb[1].mxu1 }
 0x1bb   :  { %v185_v24 = vpop.f32.mrb[2].mxu1 }
 0x1bc   :  { %v186_v25 = vadd.f32 %v258_v18, %v185_v24  ;;  %v297_v26 = vpop.f32.mrb[3].mxu1  ;;  %v193_v27 = vadd.f32 %v189_v19, %v183_v21 }
 0x1be   :  { %v195_v28 = vsel %vm57_vm1, %v193_v27, 0.0  ;;  %v194_v29 = vadd.f32 %v190_v23, %v186_v25 }
 0x1bf   :  { %196 = vadd.xlane.f32.xlu0 %v195_v28 }
 0x1c0   :  { %v198_v30 = vsel %vm57_vm1, %v194_v29, 0.0 }
 0x1c3   :  { %199 = vadd.xlane.f32.xlu0 %v198_v30 }
 0x24c   :  { %v197_v31 = vpop.xlane.xlu0 %196 }
 0x24d   :  { %v202_v32 = vmul.f32 0.03125, %v197_v31 }
 0x24f   :  { %v204_v33 = vsub.f32 %v193_v27, %v202_v32 }
 0x250   :  { %v200_v34 = vpop.xlane.xlu0 %199 }
 0x251   :  { %v203_v35 = vmul.f32 0.03125, %v200_v34  ;;  %v206_v36 = vmul.f32 %v204_v33, %v204_v33 }
 0x253   :  { %v205_v37 = vsub.f32 %v194_v29, %v203_v35  ;;  %v208_v38 = vsel %vm57_vm1, %v206_v36, 0.0 }
 0x254   :  { %209 = vadd.xlane.f32.xlu1 %v208_v38 }
 0x255   :  { %v207_v39 = vmul.f32 %v205_v37, %v205_v37 }
 0x257   :  { %v211_v40 = vsel %vm57_vm1, %v207_v39, 0.0 }
 0x258   :  { %212 = vadd.xlane.f32.xlu1 %v211_v40 }
 0x2e1   :  { %v210_v41 = vpop.xlane.xlu1 %209 }
 0x2e2   :  { %v214_v42 = vmul.f32 0.03125, %v210_v41 }
 0x2e4   :  { %v216_v43 = vadd.f32 1e-05, %v214_v42 }
 0x2e5   :  { %v213_v44 = vpop.xlane.xlu1 %212 }
 0x2e6   :  { %308 = vrsqrt.f32 %v216_v43  ;;  %v215_v45 = vmul.f32 0.03125, %v213_v44 }
 0x2e8   :  { %v217_v46 = vadd.f32 1e-05, %v215_v45 }
 0x2ea   :  { %310 = vrsqrt.f32 %v217_v46 }
 0x2f0   :  { %v309_v47 = vpop.eup %308 }
 0x2f1   :  { %v220_v49 = vmul.f32 %v309_v47, %v204_v33 }
 0x2f3   :  { %v228_v51 = vmul.f32 %v264_v48, %v220_v49 }
 0x2f4   :  { %v311_v52 = vpop.eup %310 }
 0x2f5   :  { %v236_v53 = vadd.f32 %v265_v50, %v228_v51  ;;  %v221_v54 = vmul.f32 %v311_v52, %v205_v37 }
 0x2f7   :  { %v268_v55 = vpack.c.bf16 %v236_v53, %v236_v53  ;;  %v229_v56 = vmul.f32 %v264_v48, %v221_v54 }
 0x2f9   :  { %247 = vst.msk [vmem:[%s405_s7] sm:$0xf] %vm246_vm3, %v268_v55  ;;  %v237_v57 = vadd.f32 %v265_v50, %v229_v56 }
 0x2fb   :  { %v269_v58 = vpack.c.bf16 %v237_v57, %v237_v57 }
 0x2fd   :  { %248 = vst.msk [vmem:[%s405_s7 + $0x4] sm:$0xf] %vm246_vm3, %v269_v58 }

// kernel: transformer_decoder.13
= control target key start
LH: loop header
LB: loop body
LE: loop exit
PB: predicated region body
PF: predicated region fallthrough
CT: control target
= control target key end

     0   :  { %v117_v0 = vmov 0.0   ;;  %vm118_vm0 = vmmov 0   ;;  %vm45_vm1 = vcmask 261120   ;;  %s157_s1 = inlined_call_operand.vmem [shape: bf16[32,128], index: 1, kind: input, shape index: {}]   ;;  %s158_s0 = inlined_call_operand.vmem [shape: bf16[16,32], index: 0, kind: input, shape index: {}]   ;;  %s159_s2 = inlined_call_operand.vmem [shape: f32[1,128], index: 2, kind: input, shape index: {}]   ;;  %s160_s3 = inlined_call_operand.vmem [shape: f32[16,128], index: 3, kind: output, shape index: {}]  }
   0x1   :  { %104 = vmatprep.subr.bf16.mxu0 %v117_v0  ;;  %v114_v1 = vld [vmem:[%s157_s1] sm:$0xff]   ;;  %108 = vmatprep.mubr.msk.bf16.mxu0 %vm118_vm0, %v117_v0  ;;  %v115_v2 = vld [vmem:[%s157_s1 + $0x8] sm:$0xff]  }
   0x2   :  { %105 = vmatpush3.bf16.msra.mxu0 %v114_v1  ;;  %v116_v3 = vld [vmem:[%s158_s0] sm:$0xff]  }
   0x3   :  { %106 = vmatprep.subr.bf16.mxu0 %v117_v0  ;;  %v96_v4 = vld [vmem:[%s159_s2] ss:$0 sm:$0xff] }
   0x6   :  { %107 = vmatpush3.bf16.msra.mxu0 %v115_v2 }
   0x9   :  { %109 = vmatmul.mubr.msk.bf16.vlgmr.msra.gmra.mrb[0].mxu0 %vm45_vm1, %v116_v3 }
  0xdc   :  { %v83_v5 = vpop.f32.mrb[0].mxu0 }
  0xdd   :  { %v84_v6 = vadd.f32 %v96_v4, %v83_v5  ;;  %v110_v7 = vpop.f32.mrb[1].mxu0 }
  0xde   :  { %v86_v8 = vpop.f32.mrb[2].mxu0 }
  0xdf   :  { %90 = vst [vmem:[%s160_s3] sm:$0xff] %v84_v6  ;;  %v87_v9 = vadd.f32 %v96_v4, %v86_v8  ;;  %v111_v10 = vpop.f32.mrb[3].mxu0 }
  0xe1   :  { %91 = vst [vmem:[%s160_s3 + $0x8] sm:$0xff] %v87_v9 }

// kernel: transformer_decoder.8
= control target key start
LH: loop header
LB: loop body
LE: loop exit
PB: predicated region body
PF: predicated region fallthrough
CT: control target
= control target key end

     0   :  { %s1614_s13 = smov 0   ;;  %s1616_s14 = smov 0   ;;  %s1800_s0 = inlined_call_operand.vmem [shape: bf16[2,8,32], index: 0, kind: input, shape index: {}]   ;;  %s1801_s1 = inlined_call_operand.vmem [shape: bf16[2,10,32], index: 1, kind: input, shape index: {}]   ;;  %s1802_s2 = inlined_call_operand.vmem [shape: bf16[32,32], index: 2, kind: input, shape index: {}]   ;;  %s1803_s3 = inlined_call_operand.vmem [shape: f32[1,32], index: 3, kind: input, shape index: {}]   ;;  %s1804_s4 = inlined_call_operand.vmem [shape: bf16[32,64], index: 4, kind: input, shape index: {}]   ;;  %s1805_s5 = inlined_call_operand.vmem [shape: f32[1,64], index: 5, kind: input, shape index: {}]   ;;  %s1806_s6 = inlined_call_operand.vmem [shape: bf16[32,32], index: 6, kind: input, shape index: {}]   ;;  %s1807_s7 = inlined_call_operand.vmem [shape: f32[1,32], index: 7, kind: input, shape index: {}]   ;;  %s1808_s8 = inlined_call_operand.vmem [shape: f32[1,32], index: 8, kind: input, shape index: {}]   ;;  %s1809_s9 = inlined_call_operand.vmem [shape: f32[1,32], index: 9, kind: input, shape index: {}]   ;;  %s1810_s10 = inlined_call_operand.vmem [shape: bf16[2,8,32], index: 10, kind: output, shape index: {}]  }
   0x1   :  { %s1618_s15 = smov 0  }
   0x2 LB: > { %s32_s16 = sadd.s32 1, %s1544_s14  ;;  %p1320_p0 = scmp.ge.s32.totalorder %s1548_s15, 1  ;;  %s1548_s15 = sphi %s1618_s15, %s20_s15   ;;  %s1544_s14 = sphi %s1616_s14, %s1812_s14   ;;  %s1540_s13 = sphi %s1614_s13, %s1811_s13  }
   0x3   : > { %p34_p1 = scmp.ge.s32.totalorder %s32_s16, 2  ;;  %p340_p2 = scmp.lt.s32.totalorder %s1548_s15, 3 }
   0x5   : > { %s1814_s16 = smov (%p34_p1, %s32_s16), 0  ;;  %p341_p3 = pnand %p1320_p0, %p340_p2 }
   0x6   : > { %v1503_v0 = vld [vmem:[%s1804_s4] sm:$0xff] (!%p341_p3)   ;;  %v1550_v1 = vmov (!%p341_p3), 0.0   ;;  %v1504_v2 = vld [vmem:[%s1804_s4 + $0x8] sm:$0xff] (!%p341_p3)   ;;  %vm1551_vm0 = vmmov (!%p341_p3), 0   ;;  %p387_p4 = scmp.lt.s32.totalorder (!%p341_p3), %s1540_s13, 1  ;;  %vm433_vm1 = vcmask (!%p341_p3), 261120  }
   0x7   : > { %344 = sbr.rel (%p341_p3) target bundleno = 2921 (0xb69), region = 60  ;;  %1390 = vmatprep.subr.bf16.mxu1 (!%p341_p3), %v1550_v1  ;;  %1382 = vmatprep.subr.bf16.mxu0 (!%p341_p3), %v1550_v1  ;;  %v1506_v3 = vld [vmem:[%s1802_s2] sm:$0xff] (!%p341_p3)   ;;  %v1507_v4 = vld [vmem:[%s1802_s2 + $0x8] sm:$0xff] (!%p341_p3)   ;;  %vm555_vm2 = vcmask (!%p341_p3), 64512   ;;  %s1552_s21 = smov (!%p341_p3), 120   ;;  %vm602_vm3 = vcmask (!%p341_p3), 80896  }
   0x8   : > { %1391 = vmatpush3.bf16.msra.mxu1 (!%p341_p3), %v1503_v0  ;;  %1394 = vmatprep.mubr.msk.bf16.mxu1 (!%p341_p3), %vm1551_vm0, %v1550_v1  ;;  %v1329_v7 = vld [vmem:[%s1805_s5] ss:$0 sm:$0xff] (!%p341_p3)  ;;  %s1553_s22 = smov (!%p341_p3), 96   ;;  %vm621_vm4 = vcmask (!%p341_p3), 1044480   ;;  %s1554_s23 = smov (!%p341_p3), 88   ;;  %vm781_vm5 = vcmask (!%p341_p3), 1043456  }
   0x9   : > { %1392 = vmatprep.subr.bf16.mxu1 (!%p341_p3), %v1550_v1  ;;  %1386 = vmatprep.mubr.msk.bf16.mxu0 (!%p341_p3), %vm1551_vm0, %v1550_v1  ;;  %v1325_v9 = vld [vmem:[%s1803_s3] ss:$0 sm:$0xff] (!%p341_p3)  ;;  %s1555_s24 = smov (!%p341_p3), 112   ;;  %v550_v52 = vld [vmem:[%s1806_s6 + $0x4] sm:$0xf] (!%p341_p3)  ;;  %s1556_s30 = smov (!%p341_p3), 80  }
   0xa   : > { %1383 = vmatpush3.bf16.msra.mxu0 (!%p341_p3), %v1506_v3  ;;  %v783_v53 = vsel (!%p341_p3), %vm781_vm5, %v550_v52, 0  ;;  %v549_v58 = vld [vmem:[%s1806_s6] sm:$0xf] (!%p341_p3)  ;;  %s1557_s11 = smov (!%p341_p3), 104   ;;  %s1558_s18 = smov (!%p341_p3), 72   ;;  %vm1228_vm6 = vcmask (!%p341_p3), 257024  }
   0xb   : > { %1384 = vmatprep.subr.bf16.mxu0 (!%p341_p3), %v1550_v1  ;;  %v829_v61 = vsel (!%p341_p3), %vm781_vm5, %v549_v58, 0 }
   0xc   : > { %1393 = vmatpush3.bf16.msra.mxu1 (!%p341_p3), %v1504_v2 }
   0xd   : > { %1404 = vmatprep.subr.bf16.mxu1 (!%p341_p3), %v1550_v1 }
   0xe   : > { %s1816_s13 = smov (!%p387_p4, %s1540_s13), 1  ;;  %1385 = vmatpush3.bf16.msra.mxu0 %v1507_v4 }
   0xf   : > { %s1351_s25 = sshll.u32 %s1816_s13, 3  ;;  %s1321_s26 = sshll.u32 %s1816_s13, 2  ;;  %1398 = vmatprep.subr.bf16.mxu0 %v1550_v1 }
  0x10   : > { %s398_s29 = scalar_lea.vmem %s1801_s1, %s1351_s25  ;;  %s393_s12 = scalar_lea.vmem %s1800_s0, %s1321_s26 }
  0x11   : > { %v1505_v5 = vld [vmem:[%s398_s29] sm:$0x1f]  }
  0x12   : > { %v1665_v6 = vld [vmem:[%s393_s12] sm:$0xf]  ;;  %1395 = vmatmul.mubr.msk.bf16.vlgmr.msra.gmra.mrb[0].mxu1 %vm433_vm1, %v1505_v5 }
  0x13   : > { %1406 = vmatprep.mubr.msk.bf16.mxu1 %vm1551_vm0, %v1550_v1  ;;  %1387 = vmatmul.mubr.msk.bf16.vlgmr.msra.gmra.mrb[0].mxu0 %vm433_vm1, %v1665_v6 }
  0x14   : > { %1400 = vmatprep.mubr.msk.bf16.mxu0 %vm1551_vm0, %v1550_v1 }
  0xe5   : > { %v542_v8 = vpop.f32.mrb[0].mxu1 }
  0xe6   : > { %v1396_v10 = vpop.f32.mrb[1].mxu1  ;;  %v471_v12 = vpop.f32.mrb[0].mxu0  ;;  %v543_v13 = vadd.f32 %v1329_v7, %v542_v8 }
  0xe7   : > { %v545_v11 = vpop.f32.mrb[2].mxu1  ;;  %v472_v16 = vadd.f32 %v1325_v9, %v471_v12  ;;  %v1388_v17 = vpop.f32.mrb[1].mxu0 }
  0xe8   : > { %v546_v14 = vadd.f32 %v1329_v7, %v545_v11  ;;  %v1397_v15 = vpop.f32.mrb[3].mxu1  ;;  %v474_v18 = vpop.f32.mrb[2].mxu0 }
  0xe9   : > { %v1389_v20 = vpop.f32.mrb[3].mxu0  ;;  %v1684_v21 = vpack.c.bf16 %v472_v16, %v472_v16 }
  0xea   : > { %v1681_v19 = vpack.c.bf16 %v546_v14, %v543_v13 }
  0xec   : > { %669 = vrot.lane.b32.xlu0 %v1681_v19, %s1552_s21  ;;  %v560_v22 = vsel %vm555_vm2, %v1681_v19, 0 }
  0xed   : > { %1399 = vmatpush3.bf16.xpose.msra.mxu0 %v560_v22 }
  0xee   : > { %1410 = vmatprep.subr.bf16.mxu0 %v1550_v1 }
  0xf0   : > { %667 = vrot.lane.b32.xlu0 %v1684_v21, %s1552_s21 }
  0xf4   : > { %1401 = vmatmul.mubr.msk.bf16.vlgmr.msra.gmra.mrb[4].mxu0 %vm555_vm2, %v1684_v21 }
  0xf5   : > { %1412 = vmatprep.mubr.msk.bf16.mxu0 %vm1551_vm0, %v1550_v1 }
 0x15e   : > { %v670_v23 = vpop.permute.xlu0 %669 }
 0x15f   : > { %v675_v24 = vsel %vm555_vm2, %v670_v23, 0 }
 0x160   : > { %1411 = vmatpush3.bf16.xpose.msra.mxu0 %v675_v24 }
 0x161   : > { %1422 = vmatprep.subr.bf16.mxu0 %v1550_v1 }
 0x162   : > { %v668_v25 = vpop.permute.xlu0 %667 }
 0x167   : > { %1413 = vmatmul.mubr.msk.bf16.vlgmr.msra.gmra.mrb[8].mxu0 %vm555_vm2, %v668_v25 }
 0x168   : > { %1424 = vmatprep.mubr.msk.bf16.mxu0 %vm1551_vm0, %v1550_v1  ;;  %1423 = vmatpush3.bf16.msra.mxu0 %v783_v53 }
 0x169   : > { %1434 = vmatprep.subr.bf16.mxu0 %v1550_v1 }
 0x1c7   : > { %v596_v26 = vpop.f32.mrb[4].mxu0 }
 0x1c8   : > { %v1402_v27 = vpop.f32.mrb[5].mxu0  ;;  %v603_v28 = vsel %vm602_vm3, %v596_v26, -inf }
 0x1c9   : > { %604 = vmax.xlane.f32.xlu1 %v603_v28  ;;  %v599_v29 = vpop.f32.mrb[6].mxu0 }
 0x1ca   : > { %v1403_v30 = vpop.f32.mrb[7].mxu0 }
 0x23a   : > { %v711_v31 = vpop.f32.mrb[8].mxu0 }
 0x23b   : > { %v1414_v32 = vpop.f32.mrb[9].mxu0  ;;  %v717_v33 = vsel %vm602_vm3, %v711_v31, -inf }
 0x23c   : > { %718 = vmax.xlane.f32.xlu1 %v717_v33  ;;  %v714_v34 = vpop.f32.mrb[10].mxu0 }
 0x23d   : > { %v1415_v35 = vpop.f32.mrb[11].mxu0 }
 0x24d   : > { %616 = vrot.lane.b32.xlu1 %v1681_v19, %s1553_s22 }
 0x256   : > { %v605_v36 = vpop.xlane.xlu1 %604 }
 0x257   : > { %v606_v37 = vsub.f32 %v596_v26, %v605_v36 }
 0x259   : > { %v607_v38 = vmul.f32 1.442695, %v606_v37 }
 0x25b   : > { %1508 = vpow2.f32 %v607_v38 }
 0x265   : > { %v1509_v39 = vpop.eup %1508 }
 0x266   : > { %v609_v40 = vsel %vm602_vm3, %v1509_v39, 0.0 }
 0x267   : > { %610 = vadd.xlane.f32.xlu0 %v609_v40 }
 0x2c9   : > { %v719_v41 = vpop.xlane.xlu1 %718 }
 0x2ca   : > { %v720_v42 = vsub.f32 %v711_v31, %v719_v41 }
 0x2cc   : > { %v721_v43 = vmul.f32 1.442695, %v720_v42  ;;  %v551_v42 = vld [vmem:[%s1806_s6 + $0x8] sm:$0xf] }
 0x2cd   : > { %v617_v44 = vpop.permute.xlu1 %616 }
 0x2ce   : > { %1510 = vpow2.f32 %v721_v43  ;;  %v623_v45 = vsel %vm621_vm4, %v617_v44, 0  ;;  %v986_v43 = vsel %vm781_vm5, %v551_v42, 0 }
 0x2cf   : > { %1405 = vmatpush3.bf16.msra.mxu1 %v623_v45 }
 0x2d0   : > { %1416 = vmatprep.subr.bf16.mxu1 %v1550_v1 }
 0x2d8   : > { %v1511_v46 = vpop.eup %1510 }
 0x2d9   : > { %v723_v47 = vsel %vm602_vm3, %v1511_v46, 0.0 }
 0x2da   : > { %724 = vadd.xlane.f32.xlu1 %v723_v47 }
 0x2eb   : > { %729 = vrot.lane.b32.xlu1 %v1681_v19, %s1554_s23 }
 0x2ef   : > { %873 = vrot.lane.b32.xlu1 %v1681_v19, %s1555_s24 }
 0x2f3   : > { %871 = vrot.lane.b32.xlu1 %v1684_v21, %s1555_s24 }
 0x2f4   : > { %v611_v48 = vpop.xlane.xlu0 %610 }
 0x2f5   : > { %1512 = vrcp.f32 %v611_v48 }
 0x2ff   : > { %v1513_v49 = vpop.eup %1512 }
 0x300   : > { %v613_v50 = vmul.f32 %v1513_v49, %v1509_v39 }
 0x302   : > { %v614_v51 = vpack.c.bf16 %v613_v50, %v613_v50 }
 0x304   : > { %1407 = vmatmul.mubr.msk.bf16.vlgmr.msra.gmra.mrb[4].mxu1 %vm602_vm3, %v614_v51 }
 0x305   : > { %1418 = vmatprep.mubr.msk.bf16.mxu1 %vm1551_vm0, %v1550_v1 }
 0x367   : > { %v725_v54 = vpop.xlane.xlu1 %724 }
 0x368   : > { %1514 = vrcp.f32 %v725_v54 }
 0x36b   : > { %v730_v55 = vpop.permute.xlu1 %729 }
 0x36c   : > { %v735_v56 = vsel %vm621_vm4, %v730_v55, 0 }
 0x36d   : > { %1417 = vmatpush3.bf16.msra.mxu1 %v735_v56 }
 0x36e   : > { %1428 = vmatprep.subr.bf16.mxu1 %v1550_v1 }
 0x36f   : > { %v874_v4 = vpop.permute.xlu1 %873 }
 0x370   : > { %v879_v10 = vsel %vm555_vm2, %v874_v4, 0 }
 0x372   : > { %v1515_v57 = vpop.eup %1514 }
 0x373   : > { %v727_v59 = vmul.f32 %v1515_v57, %v1511_v46  ;;  %v872_v12 = vpop.permute.xlu1 %871 }
 0x375   : > { %v728_v60 = vpack.c.bf16 %v727_v59, %v727_v59 }
 0x377   : > { %1419 = vmatmul.mubr.msk.bf16.vlgmr.msra.gmra.mrb[8].mxu1 %vm602_vm3, %v728_v60 }
 0x378   : > { %1429 = vmatpush3.bf16.msra.mxu1 %v829_v61  ;;  %1430 = vmatprep.mubr.msk.bf16.mxu1 %vm1551_vm0, %v1550_v1 }
 0x379   : > { %1440 = vmatprep.subr.bf16.mxu1 %v1550_v1 }
 0x3d7   : > { %v659_v62 = vpop.f32.mrb[4].mxu1 }
 0x3d8   : > { %v665_v63 = vpack.c.bf16 %v659_v62, %v659_v62  ;;  %v1408_v0 = vpop.f32.mrb[5].mxu1 }
 0x3d9   : > { %v662_v2 = vpop.f32.mrb[6].mxu1 }
 0x3da   : > { %v1409_v3 = vpop.f32.mrb[7].mxu1  ;;  %1431 = vmatmul.mubr.msk.bf16.vlgmr.msra.gmra.mrb[12].mxu1 %vm555_vm2, %v665_v63 }
 0x3db   : > { %1442 = vmatprep.mubr.msk.bf16.mxu1 %vm1551_vm0, %v1550_v1 }
 0x44a   : > { %v771_v5 = vpop.f32.mrb[8].mxu1 }
 0x44b   : > { %v777_v7 = vpack.c.bf16 %v771_v5, %v771_v5  ;;  %v1420_v8 = vpop.f32.mrb[9].mxu1 }
 0x44c   : > { %v774_v9 = vpop.f32.mrb[10].mxu1 }
 0x44d   : > { %v1421_v11 = vpop.f32.mrb[11].mxu1  ;;  %1425 = vmatmul.mubr.msk.bf16.vlgmr.msra.gmra.mrb[12].mxu0 %vm555_vm2, %v777_v7 }
 0x44e   : > { %1435 = vmatpush3.bf16.xpose.msra.mxu0 %v879_v10  ;;  %1436 = vmatprep.mubr.msk.bf16.mxu0 %vm1551_vm0, %v1550_v1 }
 0x44f   : > { %1446 = vmatprep.subr.bf16.mxu0 %v1550_v1 }
 0x455   : > { %1437 = vmatmul.mubr.msk.bf16.vlgmr.msra.gmra.mrb[16].mxu0 %vm555_vm2, %v872_v12 }
 0x456   : > { %1448 = vmatprep.mubr.msk.bf16.mxu0 %vm1551_vm0, %v1550_v1  ;;  %1447 = vmatpush3.bf16.msra.mxu0 %v986_v43 }
 0x457   : > { %1458 = vmatprep.subr.bf16.mxu0 %v1550_v1 }
 0x4ad   : > { %v865_v13 = vpop.f32.mrb[12].mxu1 }
 0x4ae   : > { %v1432_v14 = vpop.f32.mrb[13].mxu1 }
 0x4af   : > { %v868_v15 = vpop.f32.mrb[14].mxu1  ;;  %v1346_v14 = vld [vmem:[%s1807_s7] ss:$0 sm:$0xff] }
 0x4b0   : > { %v1433_v16 = vpop.f32.mrb[15].mxu1 }
 0x520   : > { %v819_v17 = vpop.f32.mrb[12].mxu0 }
 0x521   : > { %v1738_v18 = vadd.f32 %v865_v13, %v819_v17  ;;  %v1426_v20 = vpop.f32.mrb[13].mxu0  ;;  %v1195_v17 = vunpack.c.l.bf16 %v1665_v6 }
 0x522   : > { %v822_v22 = vpop.f32.mrb[14].mxu0 }
 0x523   : > { %v1427_v23 = vpop.f32.mrb[15].mxu0 }
 0x528   : > { %v915_v24 = vpop.f32.mrb[16].mxu0 }
 0x529   : > { %v1438_v25 = vpop.f32.mrb[17].mxu0  ;;  %v921_v26 = vsel %vm602_vm3, %v915_v24, -inf }
 0x52a   : > { %922 = vmax.xlane.f32.xlu0 %v921_v26  ;;  %v918_v27 = vpop.f32.mrb[18].mxu0 }
 0x52b   : > { %v1439_v28 = vpop.f32.mrb[19].mxu0 }
 0x540   : > { %933 = vrot.lane.b32.xlu0 %v1681_v19, %s1556_s30  ;;  %s405_s30 = scalar_lea.vmem %s1810_s10, %s1321_s26 }
 0x544   : > { %1031 = vrot.lane.b32.xlu0 %v1681_v19, %s1557_s11 }
 0x548   : > { %1029 = vrot.lane.b32.xlu0 %v1684_v21, %s1557_s11 }
 0x5b7   : > { %v923_v29 = vpop.xlane.xlu0 %922 }
 0x5b8   : > { %v924_v30 = vsub.f32 %v915_v24, %v923_v29 }
 0x5ba   : > { %v925_v31 = vmul.f32 1.442695, %v924_v30 }
 0x5bb   : > { %v934_v32 = vpop.permute.xlu0 %933 }
 0x5bc   : > { %1516 = vpow2.f32 %v925_v31  ;;  %v939_v33 = vsel %vm621_vm4, %v934_v32, 0 }
 0x5bd   : > { %1441 = vmatpush3.bf16.msra.mxu1 %v939_v33  ;;  %v1347_v33 = vld [vmem:[%s1808_s8] ss:$0 sm:$0xff] }
 0x5be   : > { %1452 = vmatprep.subr.bf16.mxu1 %v1550_v1 }
 0x5bf   : > { %v1032_v39 = vpop.permute.xlu0 %1031 }
 0x5c0   : > { %v1037_v40 = vsel %vm555_vm2, %v1032_v39, 0 }
 0x5c3   : > { %v1030_v41 = vpop.permute.xlu0 %1029 }
 0x5c6   : > { %v1517_v34 = vpop.eup %1516 }
 0x5c7   : > { %v927_v35 = vsel %vm602_vm3, %v1517_v34, 0.0 }
 0x5c8   : > { %928 = vadd.xlane.f32.xlu1 %v927_v35  ;;  %v1348_v35 = vld [vmem:[%s1809_s9] ss:$0 sm:$0xff] }
 0x655   : > { %v929_v36 = vpop.xlane.xlu1 %928 }
 0x656   : > { %1518 = vrcp.f32 %v929_v36 }
 0x660   : > { %v1519_v37 = vpop.eup %1518 }
 0x661   : > { %v931_v38 = vmul.f32 %v1519_v37, %v1517_v34 }
 0x663   : > { %v932_v21 = vpack.c.bf16 %v931_v38, %v931_v38 }
 0x665   : > { %1443 = vmatmul.mubr.msk.bf16.vlgmr.msra.gmra.mrb[16].mxu1 %vm602_vm3, %v932_v21 }
 0x666   : > { %1453 = vmatpush3.bf16.xpose.msra.mxu1 %v1037_v40  ;;  %1454 = vmatprep.mubr.msk.bf16.mxu1 %vm1551_vm0, %v1550_v1 }
 0x667   : > { %1464 = vmatprep.subr.bf16.mxu1 %v1550_v1 }
 0x66d   : > { %1455 = vmatmul.mubr.msk.bf16.vlgmr.msra.gmra.mrb[20].mxu1 %vm555_vm2, %v1030_v41 }
 0x66e   : > { %1466 = vmatprep.mubr.msk.bf16.mxu1 %vm1551_vm0, %v1550_v1 }
 0x738   : > { %v975_v44 = vpop.f32.mrb[16].mxu1 }
 0x739   : > { %v981_v45 = vpack.c.bf16 %v975_v44, %v975_v44  ;;  %v1444_v46 = vpop.f32.mrb[17].mxu1 }
 0x73a   : > { %v978_v47 = vpop.f32.mrb[18].mxu1 }
 0x73b   : > { %v1445_v48 = vpop.f32.mrb[19].mxu1  ;;  %1449 = vmatmul.mubr.msk.bf16.vlgmr.msra.gmra.mrb[20].mxu0 %vm555_vm2, %v981_v45 }
 0x73c   : > { %1460 = vmatprep.mubr.msk.bf16.mxu0 %vm1551_vm0, %v1550_v1  ;;  %v552_v1 = vld [vmem:[%s1806_s6 + $0xc] sm:$0xf] }
 0x73d   : > { %v1144_v59 = vsel %vm781_vm5, %v552_v1, 0 }
 0x73e   : > { %1465 = vmatpush3.bf16.msra.mxu1 %v1144_v59 }
 0x740   : > { %v1073_v49 = vpop.f32.mrb[20].mxu1 }
 0x741   : > { %v1456_v50 = vpop.f32.mrb[21].mxu1  ;;  %v1079_v51 = vsel %vm602_vm3, %v1073_v49, -inf }
 0x742   : > { %1080 = vmax.xlane.f32.xlu0 %v1079_v51  ;;  %v1076_v52 = vpop.f32.mrb[22].mxu1 }
 0x743   : > { %v1457_v53 = vpop.f32.mrb[23].mxu1 }
 0x7cf   : > { %v1081_v54 = vpop.xlane.xlu0 %1080 }
 0x7d0   : > { %v1082_v55 = vsub.f32 %v1073_v49, %v1081_v54 }
 0x7d2   : > { %v1083_v56 = vmul.f32 1.442695, %v1082_v55 }
 0x7d4   : > { %1520 = vpow2.f32 %v1083_v56 }
 0x7de   : > { %v1521_v57 = vpop.eup %1520 }
 0x7df   : > { %v1085_v58 = vsel %vm602_vm3, %v1521_v57, 0.0 }
 0x7e0   : > { %1086 = vadd.xlane.f32.xlu1 %v1085_v58 }
 0x7f1   : > { %1091 = vrot.lane.b32.xlu1 %v1681_v19, %s1558_s18 }
 0x80e   : > { %v1022_v60 = vpop.f32.mrb[20].mxu0 }
 0x80f   : > { %v1028_v61 = vadd.f32 %v1022_v60, %v1738_v18  ;;  %v1450_v62 = vpop.f32.mrb[21].mxu0 }
 0x810   : > { %v1025_v63 = vpop.f32.mrb[22].mxu0 }
 0x811   : > { %v1451_v0 = vpop.f32.mrb[23].mxu0 }
 0x86d   : > { %v1087_v2 = vpop.xlane.xlu1 %1086 }
 0x86e   : > { %1522 = vrcp.f32 %v1087_v2 }
 0x871   : > { %v1092_v3 = vpop.permute.xlu1 %1091 }
 0x872   : > { %v1097_v4 = vsel %vm621_vm4, %v1092_v3, 0 }
 0x873   : > { %1459 = vmatpush3.bf16.msra.mxu0 %v1097_v4 }
 0x878   : > { %v1523_v19 = vpop.eup %1522 }
 0x879   : > { %v1089_v5 = vmul.f32 %v1523_v19, %v1521_v57 }
 0x87b   : > { %v1090_v7 = vpack.c.bf16 %v1089_v5, %v1089_v5 }
 0x87d   : > { %1461 = vmatmul.mubr.msk.bf16.vlgmr.msra.gmra.mrb[24].mxu0 %vm602_vm3, %v1090_v7 }
 0x950   : > { %v1133_v8 = vpop.f32.mrb[24].mxu0 }
 0x951   : > { %v1139_v9 = vpack.c.bf16 %v1133_v8, %v1133_v8  ;;  %v1462_v10 = vpop.f32.mrb[25].mxu0 }
 0x952   : > { %v1136_v11 = vpop.f32.mrb[26].mxu0 }
 0x953   : > { %v1463_v12 = vpop.f32.mrb[27].mxu0  ;;  %1467 = vmatmul.mubr.msk.bf16.vlgmr.msra.gmra.mrb[24].mxu1 %vm555_vm2, %v1139_v9 }
 0xa26   : > { %v1180_v13 = vpop.f32.mrb[24].mxu1 }
 0xa27   : > { %v1186_v15 = vadd.f32 %v1180_v13, %v1028_v61  ;;  %v1468_v16 = vpop.f32.mrb[25].mxu1 }
 0xa28   : > { %v1183_v18 = vpop.f32.mrb[26].mxu1 }
 0xa29   : > { %v1194_v20 = vadd.f32 %v1346_v14, %v1186_v15  ;;  %v1469_v22 = vpop.f32.mrb[27].mxu1 }
 0xa2b   : > { %v1198_v23 = vadd.f32 %v1195_v17, %v1194_v20 }
 0xa2d   : > { %v1199_v24 = vsel %vm433_vm1, %v1198_v23, 0.0 }
 0xa2e   : > { %1200 = vadd.xlane.f32.xlu1 %v1199_v24 }
 0xabb   : > { %v1201_v25 = vpop.xlane.xlu1 %1200 }
 0xabc   : > { %v1203_v26 = vmul.f32 0.03125, %v1201_v25 }
 0xabe   : > { %v1204_v27 = vsub.f32 %v1198_v23, %v1203_v26 }
 0xac0   : > { %v1205_v28 = vmul.f32 %v1204_v27, %v1204_v27 }
 0xac2   : > { %v1206_v29 = vsel %vm433_vm1, %v1205_v28, 0.0 }
 0xac3   : > { %1207 = vadd.xlane.f32.xlu0 %v1206_v29 }
 0xb50   : > { %v1208_v30 = vpop.xlane.xlu0 %1207 }
 0xb51   : > { %v1209_v31 = vmul.f32 0.03125, %v1208_v30 }
 0xb53   : > { %v1210_v32 = vadd.f32 1e-05, %v1209_v31 }
 0xb55   : > { %1524 = vrsqrt.f32 %v1210_v32 }
 0xb5f   : > { %v1525_v6 = vpop.eup %1524 }
 0xb60   : > { %v1212_v34 = vmul.f32 %v1525_v6, %v1204_v27 }
 0xb62   : > { %v1219_v36 = vmul.f32 %v1347_v33, %v1212_v34 }
 0xb64   : > { %v1226_v37 = vadd.f32 %v1348_v35, %v1219_v36 }
 0xb66   : > { %v1227_v38 = vpack.c.bf16 %v1226_v37, %v1226_v37 }
 0xb68   : > { %1229 = vst.msk [vmem:[%s405_s30] sm:$0xf] %vm1228_vm6, %v1227_v38 }
 0xb69 PF: > { %s20_s15 = sadd.s32 1, %s1548_s15   ;;  %s1811_s13 = smov %s1544_s14 }
 0xb6a   : > { %p17_p5 = scmp.ge.s32.totalorder %s20_s15, 4   ;;  %s1812_s14 = smov %s1814_s16 }
 0xb6c   :  { %19 = sbr.rel (!%p17_p5) target bundleno = 2 (0x2), region = 93 }

// kernel: transformer_decoder.7
= control target key start
LH: loop header
LB: loop body
LE: loop exit
PB: predicated region body
PF: predicated region fallthrough
CT: control target
= control target key end

     0   :  { %s1598_s13 = smov 0   ;;  %s1600_s14 = smov 0   ;;  %s1781_s0 = inlined_call_operand.vmem [shape: bf16[2,8,32], index: 0, kind: input, shape index: {}, may-alias: {0,1}]   ;;  %s1782_s1 = inlined_call_operand.vmem [shape: bf16[2,8,32], index: 1, kind: input, shape index: {}, may-alias: {0,1}]   ;;  %s1783_s2 = inlined_call_operand.vmem [shape: bf16[32,32], index: 2, kind: input, shape index: {}]   ;;  %s1784_s3 = inlined_call_operand.vmem [shape: f32[1,32], index: 3, kind: input, shape index: {}]   ;;  %s1785_s4 = inlined_call_operand.vmem [shape: bf16[32,64], index: 4, kind: input, shape index: {}]   ;;  %s1786_s5 = inlined_call_operand.vmem [shape: f32[1,64], index: 5, kind: input, shape index: {}]   ;;  %s1787_s6 = inlined_call_operand.vmem [shape: bf16[32,32], index: 6, kind: input, shape index: {}]   ;;  %s1788_s7 = inlined_call_operand.vmem [shape: f32[1,32], index: 7, kind: input, shape index: {}]   ;;  %s1789_s8 = inlined_call_operand.vmem [shape: f32[1,32], index: 8, kind: input, shape index: {}]   ;;  %s1790_s9 = inlined_call_operand.vmem [shape: f32[1,32], index: 9, kind: input, shape index: {}]   ;;  %s1791_s10 = inlined_call_operand.vmem [shape: bf16[2,8,32], index: 10, kind: output, shape index: {}]  }
   0x1   :  { %s1602_s15 = smov 0  }
   0x2 LB: > { %s32_s16 = sadd.s32 1, %s1528_s14  ;;  %p1308_p0 = scmp.ge.s32.totalorder %s1532_s15, 1  ;;  %s1532_s15 = sphi %s1602_s15, %s20_s15   ;;  %s1528_s14 = sphi %s1600_s14, %s1793_s14   ;;  %s1524_s13 = sphi %s1598_s13, %s1792_s13  }
   0x3   : > { %p34_p1 = scmp.ge.s32.totalorder %s32_s16, 2  ;;  %p339_p2 = scmp.lt.s32.totalorder %s1532_s15, 3 }
   0x5   : > { %s1795_s16 = smov (%p34_p1, %s32_s16), 0  ;;  %p340_p3 = pnand %p1308_p0, %p339_p2 }
   0x6   : > { %v1488_v0 = vld [vmem:[%s1785_s4] sm:$0xff] (!%p340_p3)   ;;  %v1534_v1 = vmov (!%p340_p3), 0.0   ;;  %v1489_v2 = vld [vmem:[%s1785_s4 + $0x8] sm:$0xff] (!%p340_p3)   ;;  %vm1535_vm0 = vmmov (!%p340_p3), 0   ;;  %p385_p4 = scmp.lt.s32.totalorder (!%p340_p3), %s1524_s13, 1  ;;  %vm429_vm1 = vcmask (!%p340_p3), 261120  }
   0x7   : > { %343 = sbr.rel (%p340_p3) target bundleno = 2919 (0xb67), region = 60  ;;  %1375 = vmatprep.subr.bf16.mxu1 (!%p340_p3), %v1534_v1  ;;  %1367 = vmatprep.subr.bf16.mxu0 (!%p340_p3), %v1534_v1  ;;  %v1490_v3 = vld [vmem:[%s1783_s2] sm:$0xff] (!%p340_p3)   ;;  %v1491_v4 = vld [vmem:[%s1783_s2 + $0x8] sm:$0xff] (!%p340_p3)   ;;  %vm545_vm2 = vcmask (!%p340_p3), 64512   ;;  %s1536_s19 = smov (!%p340_p3), 120   ;;  %vm610_vm3 = vcmask (!%p340_p3), 1043456  }
   0x8   : > { %1376 = vmatpush3.bf16.msra.mxu1 (!%p340_p3), %v1488_v0  ;;  %1379 = vmatprep.mubr.msk.bf16.mxu1 (!%p340_p3), %vm1535_vm0, %v1534_v1  ;;  %v1316_v7 = vld [vmem:[%s1786_s5] ss:$0 sm:$0xff] (!%p340_p3)  ;;  %s1537_s20 = smov (!%p340_p3), 96   ;;  %s1538_s21 = smov (!%p340_p3), 88   ;;  %v540_v51 = vld [vmem:[%s1787_s6 + $0x4] sm:$0xf] (!%p340_p3) }
   0x9   : > { %1377 = vmatprep.subr.bf16.mxu1 (!%p340_p3), %v1534_v1  ;;  %1371 = vmatprep.mubr.msk.bf16.mxu0 (!%p340_p3), %vm1535_vm0, %v1534_v1  ;;  %v1312_v9 = vld [vmem:[%s1784_s3] ss:$0 sm:$0xff] (!%p340_p3)  ;;  %s1539_s22 = smov (!%p340_p3), 112   ;;  %v771_v52 = vsel (!%p340_p3), %vm610_vm3, %v540_v51, 0  ;;  %s1541_s29 = smov (!%p340_p3), 104   ;;  %vm1216_vm4 = vcmask (!%p340_p3), 257024  }
   0xa   : > { %1368 = vmatpush3.bf16.msra.mxu0 (!%p340_p3), %v1490_v3  ;;  %v539_v57 = vld [vmem:[%s1787_s6] sm:$0xf] (!%p340_p3)  ;;  %s1542_s12 = smov (!%p340_p3), 72  }
   0xb   : > { %1369 = vmatprep.subr.bf16.mxu0 (!%p340_p3), %v1534_v1  ;;  %v817_v60 = vsel (!%p340_p3), %vm610_vm3, %v539_v57, 0 }
   0xc   : > { %1378 = vmatpush3.bf16.msra.mxu1 (!%p340_p3), %v1489_v2 }
   0xd   : > { %1389 = vmatprep.subr.bf16.mxu1 (!%p340_p3), %v1534_v1 }
   0xe   : > { %s1797_s13 = smov (!%p385_p4, %s1524_s13), 1  ;;  %1370 = vmatpush3.bf16.msra.mxu0 %v1491_v4 }
   0xf   : > { %s1636_s25 = sshll.u32 %s1797_s13, 2  ;;  %1383 = vmatprep.subr.bf16.mxu0 %v1534_v1 }
  0x10   : > { %s395_s28 = scalar_lea.vmem %s1782_s1, %s1636_s25  ;;  %s391_s11 = scalar_lea.vmem %s1781_s0, %s1636_s25 }
  0x11   : > { %v405_v5 = vld [vmem:[%s395_s28] sm:$0xf]  ;;  %s1540_s28 = smov 80   ;;  %s402_s27 = scalar_lea.vmem %s1791_s10, %s1636_s25 }
  0x12   : > { %1380 = vmatmul.mubr.msk.bf16.vlgmr.msra.gmra.mrb[0].mxu1 %vm429_vm1, %v405_v5  ;;  %v1648_v6 = vld [vmem:[%s391_s11] sm:$0xf] }
  0x13   : > { %1391 = vmatprep.mubr.msk.bf16.mxu1 %vm1535_vm0, %v1534_v1  ;;  %1372 = vmatmul.mubr.msk.bf16.vlgmr.msra.gmra.mrb[0].mxu0 %vm429_vm1, %v1648_v6 }
  0x14   : > { %1385 = vmatprep.mubr.msk.bf16.mxu0 %vm1535_vm0, %v1534_v1 }
  0xe5   : > { %v533_v8 = vpop.f32.mrb[0].mxu1 }
  0xe6   : > { %v534_v10 = vadd.f32 %v1316_v7, %v533_v8  ;;  %v1381_v11 = vpop.f32.mrb[1].mxu1  ;;  %v467_v13 = vpop.f32.mrb[0].mxu0 }
  0xe7   : > { %v536_v12 = vpop.f32.mrb[2].mxu1  ;;  %v468_v16 = vadd.f32 %v1312_v9, %v467_v13  ;;  %v1373_v17 = vpop.f32.mrb[1].mxu0 }
  0xe8   : > { %v1663_v14 = vpack.c.bf16 %v534_v10, %v534_v10  ;;  %v1382_v15 = vpop.f32.mrb[3].mxu1  ;;  %v470_v18 = vpop.f32.mrb[2].mxu0 }
  0xe9   : > { %v1666_v19 = vpack.c.bf16 %v468_v16, %v468_v16  ;;  %v1374_v21 = vpop.f32.mrb[3].mxu0 }
  0xea   : > { %658 = vrot.lane.b32.xlu0 %v1663_v14, %s1536_s19  ;;  %v550_v20 = vsel %vm545_vm2, %v1663_v14, 0 }
  0xeb   : > { %1384 = vmatpush3.bf16.xpose.msra.mxu0 %v550_v20 }
  0xec   : > { %1395 = vmatprep.subr.bf16.mxu0 %v1534_v1 }
  0xee   : > { %656 = vrot.lane.b32.xlu0 %v1666_v19, %s1536_s19 }
  0xf2   : > { %1386 = vmatmul.mubr.msk.bf16.vlgmr.msra.gmra.mrb[4].mxu0 %vm545_vm2, %v1666_v19 }
  0xf3   : > { %1397 = vmatprep.mubr.msk.bf16.mxu0 %vm1535_vm0, %v1534_v1 }
 0x15c   : > { %v659_v22 = vpop.permute.xlu0 %658 }
 0x15d   : > { %v664_v23 = vsel %vm545_vm2, %v659_v22, 0 }
 0x15e   : > { %1396 = vmatpush3.bf16.xpose.msra.mxu0 %v664_v23 }
 0x15f   : > { %1407 = vmatprep.subr.bf16.mxu0 %v1534_v1 }
 0x160   : > { %v657_v24 = vpop.permute.xlu0 %656 }
 0x165   : > { %1398 = vmatmul.mubr.msk.bf16.vlgmr.msra.gmra.mrb[8].mxu0 %vm545_vm2, %v657_v24 }
 0x166   : > { %1409 = vmatprep.mubr.msk.bf16.mxu0 %vm1535_vm0, %v1534_v1  ;;  %1408 = vmatpush3.bf16.msra.mxu0 %v771_v52 }
 0x167   : > { %1419 = vmatprep.subr.bf16.mxu0 %v1534_v1 }
 0x1c5   : > { %v586_v25 = vpop.f32.mrb[4].mxu0 }
 0x1c6   : > { %v1387_v26 = vpop.f32.mrb[5].mxu0  ;;  %v592_v27 = vsel %vm545_vm2, %v586_v25, -inf }
 0x1c7   : > { %593 = vmax.xlane.f32.xlu1 %v592_v27  ;;  %v589_v28 = vpop.f32.mrb[6].mxu0 }
 0x1c8   : > { %v1388_v29 = vpop.f32.mrb[7].mxu0 }
 0x238   : > { %v700_v30 = vpop.f32.mrb[8].mxu0 }
 0x239   : > { %v1399_v31 = vpop.f32.mrb[9].mxu0  ;;  %v706_v32 = vsel %vm545_vm2, %v700_v30, -inf }
 0x23a   : > { %707 = vmax.xlane.f32.xlu1 %v706_v32  ;;  %v703_v33 = vpop.f32.mrb[10].mxu0 }
 0x23b   : > { %v1400_v34 = vpop.f32.mrb[11].mxu0 }
 0x24b   : > { %605 = vrot.lane.b32.xlu1 %v1663_v14, %s1537_s20 }
 0x254   : > { %v594_v35 = vpop.xlane.xlu1 %593 }
 0x255   : > { %v595_v36 = vsub.f32 %v586_v25, %v594_v35 }
 0x257   : > { %v596_v37 = vmul.f32 1.442695, %v595_v36 }
 0x259   : > { %1492 = vpow2.f32 %v596_v37 }
 0x263   : > { %v1493_v38 = vpop.eup %1492 }
 0x264   : > { %v598_v39 = vsel %vm545_vm2, %v1493_v38, 0.0 }
 0x265   : > { %599 = vadd.xlane.f32.xlu0 %v598_v39 }
 0x2c7   : > { %v708_v40 = vpop.xlane.xlu1 %707 }
 0x2c8   : > { %v709_v41 = vsub.f32 %v700_v30, %v708_v40 }
 0x2ca   : > { %v710_v42 = vmul.f32 1.442695, %v709_v41  ;;  %v541_v41 = vld [vmem:[%s1787_s6 + $0x8] sm:$0xf] }
 0x2cb   : > { %v606_v43 = vpop.permute.xlu1 %605 }
 0x2cc   : > { %1494 = vpow2.f32 %v710_v42  ;;  %v612_v44 = vsel %vm610_vm3, %v606_v43, 0  ;;  %v974_v42 = vsel %vm610_vm3, %v541_v41, 0 }
 0x2cd   : > { %1390 = vmatpush3.bf16.msra.mxu1 %v612_v44 }
 0x2ce   : > { %1401 = vmatprep.subr.bf16.mxu1 %v1534_v1 }
 0x2d6   : > { %v1495_v45 = vpop.eup %1494 }
 0x2d7   : > { %v712_v46 = vsel %vm545_vm2, %v1495_v45, 0.0 }
 0x2d8   : > { %713 = vadd.xlane.f32.xlu1 %v712_v46 }
 0x2e9   : > { %718 = vrot.lane.b32.xlu1 %v1663_v14, %s1538_s21 }
 0x2ed   : > { %861 = vrot.lane.b32.xlu1 %v1663_v14, %s1539_s22 }
 0x2f1   : > { %859 = vrot.lane.b32.xlu1 %v1666_v19, %s1539_s22 }
 0x2f2   : > { %v600_v47 = vpop.xlane.xlu0 %599 }
 0x2f3   : > { %1496 = vrcp.f32 %v600_v47 }
 0x2fd   : > { %v1497_v48 = vpop.eup %1496 }
 0x2fe   : > { %v602_v49 = vmul.f32 %v1497_v48, %v1493_v38 }
 0x300   : > { %v603_v50 = vpack.c.bf16 %v602_v49, %v602_v49 }
 0x302   : > { %1392 = vmatmul.mubr.msk.bf16.vlgmr.msra.gmra.mrb[4].mxu1 %vm545_vm2, %v603_v50 }
 0x303   : > { %1403 = vmatprep.mubr.msk.bf16.mxu1 %vm1535_vm0, %v1534_v1 }
 0x365   : > { %v714_v53 = vpop.xlane.xlu1 %713 }
 0x366   : > { %1498 = vrcp.f32 %v714_v53 }
 0x369   : > { %v719_v54 = vpop.permute.xlu1 %718 }
 0x36a   : > { %v724_v55 = vsel %vm610_vm3, %v719_v54, 0 }
 0x36b   : > { %1402 = vmatpush3.bf16.msra.mxu1 %v724_v55 }
 0x36c   : > { %1413 = vmatprep.subr.bf16.mxu1 %v1534_v1 }
 0x36d   : > { %v862_v3 = vpop.permute.xlu1 %861 }
 0x36e   : > { %v867_v9 = vsel %vm545_vm2, %v862_v3, 0 }
 0x370   : > { %v1499_v56 = vpop.eup %1498 }
 0x371   : > { %v716_v58 = vmul.f32 %v1499_v56, %v1495_v45  ;;  %v860_v11 = vpop.permute.xlu1 %859 }
 0x373   : > { %v717_v59 = vpack.c.bf16 %v716_v58, %v716_v58 }
 0x375   : > { %1404 = vmatmul.mubr.msk.bf16.vlgmr.msra.gmra.mrb[8].mxu1 %vm545_vm2, %v717_v59 }
 0x376   : > { %1414 = vmatpush3.bf16.msra.mxu1 %v817_v60  ;;  %1415 = vmatprep.mubr.msk.bf16.mxu1 %vm1535_vm0, %v1534_v1 }
 0x377   : > { %1425 = vmatprep.subr.bf16.mxu1 %v1534_v1 }
 0x3d5   : > { %v648_v61 = vpop.f32.mrb[4].mxu1 }
 0x3d6   : > { %v654_v62 = vpack.c.bf16 %v648_v61, %v648_v61  ;;  %v1393_v63 = vpop.f32.mrb[5].mxu1 }
 0x3d7   : > { %v651_v0 = vpop.f32.mrb[6].mxu1 }
 0x3d8   : > { %v1394_v2 = vpop.f32.mrb[7].mxu1  ;;  %1416 = vmatmul.mubr.msk.bf16.vlgmr.msra.gmra.mrb[12].mxu1 %vm545_vm2, %v654_v62 }
 0x3d9   : > { %1427 = vmatprep.mubr.msk.bf16.mxu1 %vm1535_vm0, %v1534_v1 }
 0x448   : > { %v760_v4 = vpop.f32.mrb[8].mxu1 }
 0x449   : > { %v766_v5 = vpack.c.bf16 %v760_v4, %v760_v4  ;;  %v1405_v7 = vpop.f32.mrb[9].mxu1 }
 0x44a   : > { %v763_v8 = vpop.f32.mrb[10].mxu1 }
 0x44b   : > { %v1406_v10 = vpop.f32.mrb[11].mxu1  ;;  %1410 = vmatmul.mubr.msk.bf16.vlgmr.msra.gmra.mrb[12].mxu0 %vm545_vm2, %v766_v5 }
 0x44c   : > { %1420 = vmatpush3.bf16.xpose.msra.mxu0 %v867_v9  ;;  %1421 = vmatprep.mubr.msk.bf16.mxu0 %vm1535_vm0, %v1534_v1 }
 0x44d   : > { %1431 = vmatprep.subr.bf16.mxu0 %v1534_v1 }
 0x453   : > { %1422 = vmatmul.mubr.msk.bf16.vlgmr.msra.gmra.mrb[16].mxu0 %vm545_vm2, %v860_v11 }
 0x454   : > { %1433 = vmatprep.mubr.msk.bf16.mxu0 %vm1535_vm0, %v1534_v1  ;;  %1432 = vmatpush3.bf16.msra.mxu0 %v974_v42 }
 0x455   : > { %1443 = vmatprep.subr.bf16.mxu0 %v1534_v1 }
 0x4ab   : > { %v853_v12 = vpop.f32.mrb[12].mxu1 }
 0x4ac   : > { %v1417_v13 = vpop.f32.mrb[13].mxu1 }
 0x4ad   : > { %v856_v15 = vpop.f32.mrb[14].mxu1  ;;  %v1332_v13 = vld [vmem:[%s1788_s7] ss:$0 sm:$0xff] }
 0x4ae   : > { %v1418_v16 = vpop.f32.mrb[15].mxu1 }
 0x51e   : > { %v807_v17 = vpop.f32.mrb[12].mxu0 }
 0x51f   : > { %v1720_v18 = vadd.f32 %v853_v12, %v807_v17  ;;  %v1411_v20 = vpop.f32.mrb[13].mxu0  ;;  %v1183_v17 = vunpack.c.l.bf16 %v1648_v6 }
 0x520   : > { %v810_v21 = vpop.f32.mrb[14].mxu0 }
 0x521   : > { %v1412_v22 = vpop.f32.mrb[15].mxu0 }
 0x526   : > { %v903_v23 = vpop.f32.mrb[16].mxu0 }
 0x527   : > { %v1423_v24 = vpop.f32.mrb[17].mxu0  ;;  %v909_v25 = vsel %vm545_vm2, %v903_v23, -inf }
 0x528   : > { %910 = vmax.xlane.f32.xlu0 %v909_v25  ;;  %v906_v26 = vpop.f32.mrb[18].mxu0 }
 0x529   : > { %v1424_v27 = vpop.f32.mrb[19].mxu0 }
 0x53e   : > { %921 = vrot.lane.b32.xlu0 %v1663_v14, %s1540_s28 }
 0x542   : > { %1019 = vrot.lane.b32.xlu0 %v1663_v14, %s1541_s29 }
 0x546   : > { %1017 = vrot.lane.b32.xlu0 %v1666_v19, %s1541_s29 }
 0x5b5   : > { %v911_v28 = vpop.xlane.xlu0 %910 }
 0x5b6   : > { %v912_v29 = vsub.f32 %v903_v23, %v911_v28 }
 0x5b8   : > { %v913_v30 = vmul.f32 1.442695, %v912_v29 }
 0x5b9   : > { %v922_v31 = vpop.permute.xlu0 %921 }
 0x5ba   : > { %1500 = vpow2.f32 %v913_v30  ;;  %v927_v32 = vsel %vm610_vm3, %v922_v31, 0 }
 0x5bb   : > { %1426 = vmatpush3.bf16.msra.mxu1 %v927_v32  ;;  %v1333_v32 = vld [vmem:[%s1789_s8] ss:$0 sm:$0xff] }
 0x5bc   : > { %1437 = vmatprep.subr.bf16.mxu1 %v1534_v1 }
 0x5bd   : > { %v1020_v38 = vpop.permute.xlu0 %1019 }
 0x5be   : > { %v1025_v39 = vsel %vm545_vm2, %v1020_v38, 0 }
 0x5c1   : > { %v1018_v40 = vpop.permute.xlu0 %1017 }
 0x5c4   : > { %v1501_v33 = vpop.eup %1500 }
 0x5c5   : > { %v915_v34 = vsel %vm545_vm2, %v1501_v33, 0.0 }
 0x5c6   : > { %916 = vadd.xlane.f32.xlu1 %v915_v34  ;;  %v1334_v34 = vld [vmem:[%s1790_s9] ss:$0 sm:$0xff] }
 0x653   : > { %v917_v35 = vpop.xlane.xlu1 %916 }
 0x654   : > { %1502 = vrcp.f32 %v917_v35 }
 0x65e   : > { %v1503_v36 = vpop.eup %1502 }
 0x65f   : > { %v919_v37 = vmul.f32 %v1503_v36, %v1501_v33 }
 0x661   : > { %v920_v19 = vpack.c.bf16 %v919_v37, %v919_v37 }
 0x663   : > { %1428 = vmatmul.mubr.msk.bf16.vlgmr.msra.gmra.mrb[16].mxu1 %vm545_vm2, %v920_v19 }
 0x664   : > { %1438 = vmatpush3.bf16.xpose.msra.mxu1 %v1025_v39  ;;  %1439 = vmatprep.mubr.msk.bf16.mxu1 %vm1535_vm0, %v1534_v1 }
 0x665   : > { %1449 = vmatprep.subr.bf16.mxu1 %v1534_v1 }
 0x66b   : > { %1440 = vmatmul.mubr.msk.bf16.vlgmr.msra.gmra.mrb[20].mxu1 %vm545_vm2, %v1018_v40 }
 0x66c   : > { %1451 = vmatprep.mubr.msk.bf16.mxu1 %vm1535_vm0, %v1534_v1 }
 0x736   : > { %v963_v43 = vpop.f32.mrb[16].mxu1 }
 0x737   : > { %v969_v44 = vpack.c.bf16 %v963_v43, %v963_v43  ;;  %v1429_v45 = vpop.f32.mrb[17].mxu1 }
 0x738   : > { %v966_v46 = vpop.f32.mrb[18].mxu1 }
 0x739   : > { %v1430_v47 = vpop.f32.mrb[19].mxu1  ;;  %1434 = vmatmul.mubr.msk.bf16.vlgmr.msra.gmra.mrb[20].mxu0 %vm545_vm2, %v969_v44 }
 0x73a   : > { %1445 = vmatprep.mubr.msk.bf16.mxu0 %vm1535_vm0, %v1534_v1  ;;  %v542_v1 = vld [vmem:[%s1787_s6 + $0xc] sm:$0xf] }
 0x73b   : > { %v1132_v58 = vsel %vm610_vm3, %v542_v1, 0 }
 0x73c   : > { %1450 = vmatpush3.bf16.msra.mxu1 %v1132_v58 }
 0x73e   : > { %v1061_v48 = vpop.f32.mrb[20].mxu1 }
 0x73f   : > { %v1441_v49 = vpop.f32.mrb[21].mxu1  ;;  %v1067_v50 = vsel %vm545_vm2, %v1061_v48, -inf }
 0x740   : > { %1068 = vmax.xlane.f32.xlu0 %v1067_v50  ;;  %v1064_v51 = vpop.f32.mrb[22].mxu1 }
 0x741   : > { %v1442_v52 = vpop.f32.mrb[23].mxu1 }
 0x7cd   : > { %v1069_v53 = vpop.xlane.xlu0 %1068 }
 0x7ce   : > { %v1070_v54 = vsub.f32 %v1061_v48, %v1069_v53 }
 0x7d0   : > { %v1071_v55 = vmul.f32 1.442695, %v1070_v54 }
 0x7d2   : > { %1504 = vpow2.f32 %v1071_v55 }
 0x7dc   : > { %v1505_v56 = vpop.eup %1504 }
 0x7dd   : > { %v1073_v57 = vsel %vm545_vm2, %v1505_v56, 0.0 }
 0x7de   : > { %1074 = vadd.xlane.f32.xlu1 %v1073_v57 }
 0x7ef   : > { %1079 = vrot.lane.b32.xlu1 %v1663_v14, %s1542_s12 }
 0x80c   : > { %v1010_v59 = vpop.f32.mrb[20].mxu0 }
 0x80d   : > { %v1016_v60 = vadd.f32 %v1010_v59, %v1720_v18  ;;  %v1435_v61 = vpop.f32.mrb[21].mxu0 }
 0x80e   : > { %v1013_v62 = vpop.f32.mrb[22].mxu0 }
 0x80f   : > { %v1436_v63 = vpop.f32.mrb[23].mxu0 }
 0x86b   : > { %v1075_v0 = vpop.xlane.xlu1 %1074 }
 0x86c   : > { %1506 = vrcp.f32 %v1075_v0 }
 0x86f   : > { %v1080_v2 = vpop.permute.xlu1 %1079 }
 0x870   : > { %v1085_v3 = vsel %vm610_vm3, %v1080_v2, 0 }
 0x871   : > { %1444 = vmatpush3.bf16.msra.mxu0 %v1085_v3 }
 0x876   : > { %v1507_v14 = vpop.eup %1506 }
 0x877   : > { %v1077_v4 = vmul.f32 %v1507_v14, %v1505_v56 }
 0x879   : > { %v1078_v5 = vpack.c.bf16 %v1077_v4, %v1077_v4 }
 0x87b   : > { %1446 = vmatmul.mubr.msk.bf16.vlgmr.msra.gmra.mrb[24].mxu0 %vm545_vm2, %v1078_v5 }
 0x94e   : > { %v1121_v7 = vpop.f32.mrb[24].mxu0 }
 0x94f   : > { %v1127_v8 = vpack.c.bf16 %v1121_v7, %v1121_v7  ;;  %v1447_v9 = vpop.f32.mrb[25].mxu0 }
 0x950   : > { %v1124_v10 = vpop.f32.mrb[26].mxu0 }
 0x951   : > { %v1448_v11 = vpop.f32.mrb[27].mxu0  ;;  %1452 = vmatmul.mubr.msk.bf16.vlgmr.msra.gmra.mrb[24].mxu1 %vm545_vm2, %v1127_v8 }
 0xa24   : > { %v1168_v12 = vpop.f32.mrb[24].mxu1 }
 0xa25   : > { %v1174_v15 = vadd.f32 %v1168_v12, %v1016_v60  ;;  %v1453_v16 = vpop.f32.mrb[25].mxu1 }
 0xa26   : > { %v1171_v18 = vpop.f32.mrb[26].mxu1 }
 0xa27   : > { %v1182_v20 = vadd.f32 %v1332_v13, %v1174_v15  ;;  %v1454_v21 = vpop.f32.mrb[27].mxu1 }
 0xa29   : > { %v1186_v22 = vadd.f32 %v1183_v17, %v1182_v20 }
 0xa2b   : > { %v1187_v23 = vsel %vm429_vm1, %v1186_v22, 0.0 }
 0xa2c   : > { %1188 = vadd.xlane.f32.xlu1 %v1187_v23 }
 0xab9   : > { %v1189_v24 = vpop.xlane.xlu1 %1188 }
 0xaba   : > { %v1191_v25 = vmul.f32 0.03125, %v1189_v24 }
 0xabc   : > { %v1192_v26 = vsub.f32 %v1186_v22, %v1191_v25 }
 0xabe   : > { %v1193_v27 = vmul.f32 %v1192_v26, %v1192_v26 }
 0xac0   : > { %v1194_v28 = vsel %vm429_vm1, %v1193_v27, 0.0 }
 0xac1   : > { %1195 = vadd.xlane.f32.xlu0 %v1194_v28 }
 0xb4e   : > { %v1196_v29 = vpop.xlane.xlu0 %1195 }
 0xb4f   : > { %v1197_v30 = vmul.f32 0.03125, %v1196_v29 }
 0xb51   : > { %v1198_v31 = vadd.f32 1e-05, %v1197_v30 }
 0xb53   : > { %1508 = vrsqrt.f32 %v1198_v31 }
 0xb5d   : > { %v1509_v6 = vpop.eup %1508 }
 0xb5e   : > { %v1200_v33 = vmul.f32 %v1509_v6, %v1192_v26 }
 0xb60   : > { %v1207_v35 = vmul.f32 %v1333_v32, %v1200_v33 }
 0xb62   : > { %v1214_v36 = vadd.f32 %v1334_v34, %v1207_v35 }
 0xb64   : > { %v1215_v37 = vpack.c.bf16 %v1214_v36, %v1214_v36 }
 0xb66   : > { %1217 = vst.msk [vmem:[%s402_s27] sm:$0xf] %vm1216_vm4, %v1215_v37 }
 0xb67 PF: > { %s20_s15 = sadd.s32 1, %s1532_s15   ;;  %s1792_s13 = smov %s1528_s14 }
 0xb68   : > { %p17_p5 = scmp.ge.s32.totalorder %s20_s15, 4   ;;  %s1793_s14 = smov %s1795_s16 }
 0xb6a   :  { %19 = sbr.rel (!%p17_p5) target bundleno = 2 (0x2), region = 93 }

</bundles_post_ra>
